<compile_context>
chip_gen: v7x
topology: tpu7x:2x2x1
jax: 0.10.0
libtpu: 0.0.40
codegen_flags: <defaults>
</compile_context>

<pallas_src>
import functools
import math

import jax
import jax.numpy as jnp
import numpy as np
from jax import lax
from jax.experimental import pallas as pl
from jax.experimental.pallas import tpu as pltpu


def _round_up(a, m):
    return ((a + m - 1) // m) * m


def _lcm(a, b):
    return a * b // math.gcd(a, b)


# ---------------------------------------------------------------------------
# Pallas kernel: one grid step = B_blk batch elements, everything fused.
# ---------------------------------------------------------------------------
def _hybrid_kernel(x_ref, mkt_ref, bdwf_ref, bdw1b_ref, mask_ref, bias_ref,
                   out_ref, *, tap_shifts):
    """Fused conv3x3 + 2-D iDCT + concat + 1x1 for a block of batch elements.

    x_ref    : (B*Cin,  HW)   input rows (batch-major, channel-minor), lane-dense
    mkt_ref  : (HW, HW)       kron(Dh, Dw)^T  -> 2-D iDCT as one matmul
    bdwf_ref : (K*K, B*Cout, B*Cin)  block-diag fused conv-tap weights
    bdw1b_ref: (B*Cout, B*Cin)       block-diag 1x1 weights (spectral part)
    mask_ref : (K*K, 1, HW)   0/1 zero-padding masks per conv tap
    bias_ref : (B*Cout, 1)    fused bias tiled per local batch element
    out_ref  : (B*Cout, HW)
    """
    x = x_ref[...]                                              # (B*Cin, HW)

    # Spectral branch: all B*Cin rows go through the big HWxHW matmul at once.
    spec = jnp.dot(x, mkt_ref[...], preferred_element_type=jnp.float32)
    acc = jnp.dot(bdw1b_ref[...], spec, preferred_element_type=jnp.float32)

    # Conv branch folded with the 1x1: K*K tap-wise matmuls on lane-rolled
    # copies of x (in-VMEM "im2col"; nothing extra read from HBM).
    for t, shift in enumerate(tap_shifts):
        xs = x if shift == 0 else pltpu.roll(x, shift=shift, axis=1)
        xs = xs * mask_ref[t]                                   # zero-pad mask
        acc = acc + jnp.dot(bdwf_ref[t], xs,
                            preferred_element_type=jnp.float32)

    out_ref[...] = (acc + bias_ref[...]).astype(out_ref.dtype)


# ---------------------------------------------------------------------------
# Wrapper: fold weights, build masks / block-diagonal operands, pallas_call.
# ---------------------------------------------------------------------------
def inverse_dct2d_conv_block_hybrid(x, params, *, kernel_size=3, padding=1,
                                    block_batch=8):
    N, Cin, H, W = x.shape
    conv_w = params["conv_w"]            # (Cout, Cin, K, K)
    conv_b = params["conv_b"]            # (Cout,)
    dct_h = params["dct_h"]              # (H, H)
    dct_w = params["dct_w"]              # (W, W)
    w1 = params["w1"]                    # (Cout, Cout+Cin, 1, 1)
    b1 = params["b1"]                    # (Cout,)

    K = kernel_size
    Cout = conv_w.shape[0]
    HW = H * W

    # --- batch blocking (keep sublane-aligned row blocks, grid >= 2 if possible)
    align = _lcm(8 // math.gcd(8, Cin), 8 // math.gcd(8, Cout))
    B_blk = _round_up(max(1, min(block_batch, N)), align)
    Npad = _round_up(N, B_blk)
    if Npad != N:
        x = jnp.concatenate(
            [x, jnp.zeros((Npad - N, Cin, H, W), x.dtype)], axis=0)
    x2d = x.reshape(Npad * Cin, HW)

    # --- fold the 1x1 conv into both branches (everything is linear)
    w1_mat = w1.reshape(Cout, Cout + Cin)
    w1a, w1b = w1_mat[:, :Cout], w1_mat[:, Cout:]
    wf = jnp.einsum("oa,acuv->ocuv", w1a, conv_w)        # (Cout, Cin, K, K)
    bfused = w1a @ conv_b + b1                           # (Cout,)

    # --- block-diagonal (per-batch-element) weights so the batched block stays
    #     a single 2-D matmul with batch-major / channel-minor rows.
    eye_b = jnp.eye(B_blk, dtype=jnp.float32)
    taps = [(kh - padding, kw - padding)
            for kh in range(K) for kw in range(K)]
    bdwf = jnp.stack([jnp.kron(eye_b, wf[:, :, kh + padding, kw + padding])
                      for (kh, kw) in taps])             # (K*K, B*Cout, B*Cin)
    bdw1b = jnp.kron(eye_b, w1b)                         # (B*Cout, B*Cin)
    bias = jnp.tile(bfused, B_blk).reshape(B_blk * Cout, 1)

    # --- 2-D iDCT as a single matmul operand
    mkt = jnp.kron(dct_h, dct_w).T.astype(jnp.float32)   # (HW, HW)

    # --- conv-tap zero-padding masks and lane-roll shifts (static, host-built)
    hh, ww = np.meshgrid(np.arange(H), np.arange(W), indexing="ij")
    mask_np = np.stack([
        ((hh + dh >= 0) & (hh + dh < H) & (ww + dw >= 0) & (ww + dw < W))
        .reshape(1, HW).astype(np.float32)
        for (dh, dw) in taps])                           # (K*K, 1, HW)
    masks = jnp.asarray(mask_np)
    tap_shifts = tuple((-(dh * W + dw)) % HW for (dh, dw) in taps)

    grid = (Npad // B_blk,)
    grid_spec = pltpu.PrefetchScalarGridSpec(
        num_scalar_prefetch=0,
        grid=grid,
        in_specs=[
            pl.BlockSpec((B_blk * Cin, HW), lambda b: (b, 0)),          # x rows
            pl.BlockSpec((HW, HW), lambda b: (0, 0)),                   # kron DCT^T
            pl.BlockSpec((K * K, B_blk * Cout, B_blk * Cin),
                         lambda b: (0, 0, 0)),                          # conv taps
            pl.BlockSpec((B_blk * Cout, B_blk * Cin), lambda b: (0, 0)),# 1x1 spec
            pl.BlockSpec((K * K, 1, HW), lambda b: (0, 0, 0)),          # masks
            pl.BlockSpec((B_blk * Cout, 1), lambda b: (0, 0)),          # bias
        ],
        out_specs=pl.BlockSpec((B_blk * Cout, HW), lambda b: (b, 0)),
    )

    kernel = functools.partial(_hybrid_kernel, tap_shifts=tap_shifts)
    out2d = pl.pallas_call(
        kernel,
        out_shape=jax.ShapeDtypeStruct((Npad * Cout, HW), x.dtype),
        grid_spec=grid_spec,
        compiler_params=pltpu.CompilerParams(
            dimension_semantics=("parallel",)),
    )(x2d, mkt, bdwf, bdw1b, masks, bias)

    return out2d.reshape(Npad, Cout, H, W)[:N]


# ---------------------------------------------------------------------------
# Pure-JAX reference (mirrors the PyTorch forward) for a correctness check.
# ---------------------------------------------------------------------------
def reference(x, params, *, padding=1):
    conv_out = lax.conv_general_dilated(
        x, params["conv_w"], window_strides=(1, 1),
        padding=[(padding, padding), (padding, padding)],
        dimension_numbers=("NCHW", "OIHW", "NCHW"),
    ) + params["conv_b"][None, :, None, None]
    spec = jnp.einsum("hu,ncuv,wv->nchw", params["dct_h"], x, params["dct_w"])
    cat = jnp.concatenate([conv_out, spec], axis=1)
    out = lax.conv_general_dilated(
        cat, params["w1"], window_strides=(1, 1), padding="VALID",
        dimension_numbers=("NCHW", "OIHW", "NCHW"),
    ) + params["b1"][None, :, None, None]
    return out


def idct_ii_basis(n):
    # Orthonormal inverse DCT-II (DCT-III) basis:
    #   B[m, k] = w(k) * cos(pi/n * (m + 0.5) * k),  w(0)=sqrt(1/n), w(k)=sqrt(2/n)
    k = jnp.arange(n, dtype=jnp.float32)[None, :]
    m = jnp.arange(n, dtype=jnp.float32)[:, None]
    basis = jnp.cos(jnp.pi / n * (m + 0.5) * k)
    scale = jnp.where(k == 0, jnp.sqrt(1.0 / n), jnp.sqrt(2.0 / n))
    return basis * scale


def make_params(key, *, in_channels, out_channels, kernel_size, height, width):
    k1, k2, k3, k4 = jax.random.split(key, 4)
    fan_conv = in_channels * kernel_size * kernel_size
    fan_1x1 = out_channels + in_channels
    return {
        "conv_w": jax.random.normal(
            k1, (out_channels, in_channels, kernel_size, kernel_size),
            jnp.float32) / np.sqrt(fan_conv),
        "conv_b": jax.random.normal(k2, (out_channels,), jnp.float32) * 0.1,
        "dct_h": idct_ii_basis(height),
        "dct_w": idct_ii_basis(width),
        "w1": jax.random.normal(
            k3, (out_channels, fan_1x1, 1, 1), jnp.float32) / np.sqrt(fan_1x1),
        "b1": jax.random.normal(k4, (out_channels,), jnp.float32) * 0.1,
    }


if __name__ == "__main__":
    N, Cin, Cout, H, W = 16, 4, 8, 16, 16        # grid = 2 steps of 8 elements
    key = jax.random.PRNGKey(0)
    kx, kp = jax.random.split(key)
    x = jax.random.normal(kx, (N, Cin, H, W), jnp.float32)
    params = make_params(kp, in_channels=Cin, out_channels=Cout,
                         kernel_size=3, height=H, width=W)

    out = inverse_dct2d_conv_block_hybrid(x, params, block_batch=8)
    out = jax.block_until_ready(out)

    ref = jax.block_until_ready(reference(x, params))
    np.testing.assert_allclose(np.asarray(out), np.asarray(ref),
                               rtol=3e-4, atol=2e-3)
    print("KERNEL_OK")
</pallas_src>

<mosaic_0001>
module attributes {stable_mosaic.version = 11 : i64} {
  func.func @_hybrid_kernel(%arg0: i32, %arg1: memref<32x256xf32, #tpu.memory_space<vmem>>, %arg2: memref<256x256xf32, #tpu.memory_space<vmem>>, %arg3: memref<9x64x32xf32, #tpu.memory_space<vmem>>, %arg4: memref<64x32xf32, #tpu.memory_space<vmem>>, %arg5: memref<9x1x256xf32, #tpu.memory_space<vmem>>, %arg6: memref<64x1xf32, #tpu.memory_space<vmem>>, %arg7: memref<64x256xf32, #tpu.memory_space<vmem>>) attributes {dimension_semantics = [#tpu.dimension_semantics<parallel>], iteration_bounds = array<i64: 2>, scalar_prefetch = 0 : i64, scratch_operands = 0 : i64, tpu.core_type = #tpu.core_type<tc>, window_params = [{transform_indices = @transform_0, window_bounds = array<i64: 32, 256>}, {pipeline_mode = #tpu.pipeline_mode<synchronous>, transform_indices = @transform_1, window_bounds = array<i64: 256, 256>}, {pipeline_mode = #tpu.pipeline_mode<synchronous>, transform_indices = @transform_2, window_bounds = array<i64: 9, 64, 32>}, {pipeline_mode = #tpu.pipeline_mode<synchronous>, transform_indices = @transform_3, window_bounds = array<i64: 64, 32>}, {pipeline_mode = #tpu.pipeline_mode<synchronous>, transform_indices = @transform_4, window_bounds = array<i64: 9, 1, 256>}, {pipeline_mode = #tpu.pipeline_mode<synchronous>, transform_indices = @transform_5, window_bounds = array<i64: 64, 1>}, {transform_indices = @transform_6, window_bounds = array<i64: 64, 256>}]} {
    %c0 = arith.constant 0 : index
    %c0_0 = arith.constant 0 : index
    %0 = vector.load %arg1[%c0, %c0_0] : memref<32x256xf32, #tpu.memory_space<vmem>>, vector<32x256xf32>
    %c0_1 = arith.constant 0 : index
    %c0_2 = arith.constant 0 : index
    %1 = vector.load %arg2[%c0_1, %c0_2] : memref<256x256xf32, #tpu.memory_space<vmem>>, vector<256x256xf32>
    %cst = arith.constant dense<0.000000e+00> : vector<32x256xf32>
    %2 = tpu.matmul %0, %1, %cst {dimension_numbers = #tpu.dot_dimension_numbers<[1], [0], [0], [1], [0, 0, 1, 1], [], []>} : vector<32x256xf32>, vector<256x256xf32>, vector<32x256xf32> -> vector<32x256xf32>
    %c0_3 = arith.constant 0 : index
    %c0_4 = arith.constant 0 : index
    %3 = vector.load %arg4[%c0_3, %c0_4] : memref<64x32xf32, #tpu.memory_space<vmem>>, vector<64x32xf32>
    %cst_5 = arith.constant dense<0.000000e+00> : vector<64x256xf32>
    %4 = tpu.matmul %3, %2, %cst_5 {dimension_numbers = #tpu.dot_dimension_numbers<[1], [0], [0], [1], [0, 0, 1, 1], [], []>} : vector<64x32xf32>, vector<32x256xf32>, vector<64x256xf32> -> vector<64x256xf32>
    %c17_i32 = arith.constant 17 : i32
    %5 = tpu.dynamic_rotate %0 by %c17_i32 dim 1 : vector<32x256xf32>, i32 -> vector<32x256xf32>
    %c0_6 = arith.constant 0 : index
    %c0_7 = arith.constant 0 : index
    %c0_8 = arith.constant 0 : index
    %6 = vector.load %arg5[%c0_6, %c0_7, %c0_8] : memref<9x1x256xf32, #tpu.memory_space<vmem>>, vector<1x1x256xf32>
    %7 = vector.shape_cast %6 : vector<1x1x256xf32> to vector<1x256xf32>
    %8 = vector.broadcast %7 : vector<1x256xf32> to vector<32x256xf32>
    %9 = arith.mulf %5, %8 : vector<32x256xf32>
    %c0_9 = arith.constant 0 : index
    %c0_10 = arith.constant 0 : index
    %c0_11 = arith.constant 0 : index
    %10 = vector.load %arg3[%c0_9, %c0_10, %c0_11] : memref<9x64x32xf32, #tpu.memory_space<vmem>>, vector<1x64x32xf32>
    %11 = vector.shape_cast %10 : vector<1x64x32xf32> to vector<64x32xf32>
    %cst_12 = arith.constant dense<0.000000e+00> : vector<64x256xf32>
    %12 = tpu.matmul %11, %9, %cst_12 {dimension_numbers = #tpu.dot_dimension_numbers<[1], [0], [0], [1], [0, 0, 1, 1], [], []>} : vector<64x32xf32>, vector<32x256xf32>, vector<64x256xf32> -> vector<64x256xf32>
    %13 = arith.addf %4, %12 : vector<64x256xf32>
    %c16_i32 = arith.constant 16 : i32
    %14 = tpu.dynamic_rotate %0 by %c16_i32 dim 1 : vector<32x256xf32>, i32 -> vector<32x256xf32>
    %c1 = arith.constant 1 : index
    %c0_13 = arith.constant 0 : index
    %c0_14 = arith.constant 0 : index
    %15 = vector.load %arg5[%c1, %c0_13, %c0_14] : memref<9x1x256xf32, #tpu.memory_space<vmem>>, vector<1x1x256xf32>
    %16 = vector.shape_cast %15 : vector<1x1x256xf32> to vector<1x256xf32>
    %17 = vector.broadcast %16 : vector<1x256xf32> to vector<32x256xf32>
    %18 = arith.mulf %14, %17 : vector<32x256xf32>
    %c1_15 = arith.constant 1 : index
    %c0_16 = arith.constant 0 : index
    %c0_17 = arith.constant 0 : index
    %19 = vector.load %arg3[%c1_15, %c0_16, %c0_17] : memref<9x64x32xf32, #tpu.memory_space<vmem>>, vector<1x64x32xf32>
    %20 = vector.shape_cast %19 : vector<1x64x32xf32> to vector<64x32xf32>
    %cst_18 = arith.constant dense<0.000000e+00> : vector<64x256xf32>
    %21 = tpu.matmul %20, %18, %cst_18 {dimension_numbers = #tpu.dot_dimension_numbers<[1], [0], [0], [1], [0, 0, 1, 1], [], []>} : vector<64x32xf32>, vector<32x256xf32>, vector<64x256xf32> -> vector<64x256xf32>
    %22 = arith.addf %13, %21 : vector<64x256xf32>
    %c15_i32 = arith.constant 15 : i32
    %23 = tpu.dynamic_rotate %0 by %c15_i32 dim 1 : vector<32x256xf32>, i32 -> vector<32x256xf32>
    %c2 = arith.constant 2 : index
    %c0_19 = arith.constant 0 : index
    %c0_20 = arith.constant 0 : index
    %24 = vector.load %arg5[%c2, %c0_19, %c0_20] : memref<9x1x256xf32, #tpu.memory_space<vmem>>, vector<1x1x256xf32>
    %25 = vector.shape_cast %24 : vector<1x1x256xf32> to vector<1x256xf32>
    %26 = vector.broadcast %25 : vector<1x256xf32> to vector<32x256xf32>
    %27 = arith.mulf %23, %26 : vector<32x256xf32>
    %c2_21 = arith.constant 2 : index
    %c0_22 = arith.constant 0 : index
    %c0_23 = arith.constant 0 : index
    %28 = vector.load %arg3[%c2_21, %c0_22, %c0_23] : memref<9x64x32xf32, #tpu.memory_space<vmem>>, vector<1x64x32xf32>
    %29 = vector.shape_cast %28 : vector<1x64x32xf32> to vector<64x32xf32>
    %cst_24 = arith.constant dense<0.000000e+00> : vector<64x256xf32>
    %30 = tpu.matmul %29, %27, %cst_24 {dimension_numbers = #tpu.dot_dimension_numbers<[1], [0], [0], [1], [0, 0, 1, 1], [], []>} : vector<64x32xf32>, vector<32x256xf32>, vector<64x256xf32> -> vector<64x256xf32>
    %31 = arith.addf %22, %30 : vector<64x256xf32>
    %c1_i32 = arith.constant 1 : i32
    %32 = tpu.dynamic_rotate %0 by %c1_i32 dim 1 : vector<32x256xf32>, i32 -> vector<32x256xf32>
    %c3 = arith.constant 3 : index
    %c0_25 = arith.constant 0 : index
    %c0_26 = arith.constant 0 : index
    %33 = vector.load %arg5[%c3, %c0_25, %c0_26] : memref<9x1x256xf32, #tpu.memory_space<vmem>>, vector<1x1x256xf32>
    %34 = vector.shape_cast %33 : vector<1x1x256xf32> to vector<1x256xf32>
    %35 = vector.broadcast %34 : vector<1x256xf32> to vector<32x256xf32>
    %36 = arith.mulf %32, %35 : vector<32x256xf32>
    %c3_27 = arith.constant 3 : index
    %c0_28 = arith.constant 0 : index
    %c0_29 = arith.constant 0 : index
    %37 = vector.load %arg3[%c3_27, %c0_28, %c0_29] : memref<9x64x32xf32, #tpu.memory_space<vmem>>, vector<1x64x32xf32>
    %38 = vector.shape_cast %37 : vector<1x64x32xf32> to vector<64x32xf32>
    %cst_30 = arith.constant dense<0.000000e+00> : vector<64x256xf32>
    %39 = tpu.matmul %38, %36, %cst_30 {dimension_numbers = #tpu.dot_dimension_numbers<[1], [0], [0], [1], [0, 0, 1, 1], [], []>} : vector<64x32xf32>, vector<32x256xf32>, vector<64x256xf32> -> vector<64x256xf32>
    %40 = arith.addf %31, %39 : vector<64x256xf32>
    %c4 = arith.constant 4 : index
    %c0_31 = arith.constant 0 : index
    %c0_32 = arith.constant 0 : index
    %41 = vector.load %arg5[%c4, %c0_31, %c0_32] : memref<9x1x256xf32, #tpu.memory_space<vmem>>, vector<1x1x256xf32>
    %42 = vector.shape_cast %41 : vector<1x1x256xf32> to vector<1x256xf32>
    %43 = vector.broadcast %42 : vector<1x256xf32> to vector<32x256xf32>
    %44 = arith.mulf %0, %43 : vector<32x256xf32>
    %c4_33 = arith.constant 4 : index
    %c0_34 = arith.constant 0 : index
    %c0_35 = arith.constant 0 : index
    %45 = vector.load %arg3[%c4_33, %c0_34, %c0_35] : memref<9x64x32xf32, #tpu.memory_space<vmem>>, vector<1x64x32xf32>
    %46 = vector.shape_cast %45 : vector<1x64x32xf32> to vector<64x32xf32>
    %cst_36 = arith.constant dense<0.000000e+00> : vector<64x256xf32>
    %47 = tpu.matmul %46, %44, %cst_36 {dimension_numbers = #tpu.dot_dimension_numbers<[1], [0], [0], [1], [0, 0, 1, 1], [], []>} : vector<64x32xf32>, vector<32x256xf32>, vector<64x256xf32> -> vector<64x256xf32>
    %48 = arith.addf %40, %47 : vector<64x256xf32>
    %c255_i32 = arith.constant 255 : i32
    %49 = tpu.dynamic_rotate %0 by %c255_i32 dim 1 : vector<32x256xf32>, i32 -> vector<32x256xf32>
    %c5 = arith.constant 5 : index
    %c0_37 = arith.constant 0 : index
    %c0_38 = arith.constant 0 : index
    %50 = vector.load %arg5[%c5, %c0_37, %c0_38] : memref<9x1x256xf32, #tpu.memory_space<vmem>>, vector<1x1x256xf32>
    %51 = vector.shape_cast %50 : vector<1x1x256xf32> to vector<1x256xf32>
    %52 = vector.broadcast %51 : vector<1x256xf32> to vector<32x256xf32>
    %53 = arith.mulf %49, %52 : vector<32x256xf32>
    %c5_39 = arith.constant 5 : index
    %c0_40 = arith.constant 0 : index
    %c0_41 = arith.constant 0 : index
    %54 = vector.load %arg3[%c5_39, %c0_40, %c0_41] : memref<9x64x32xf32, #tpu.memory_space<vmem>>, vector<1x64x32xf32>
    %55 = vector.shape_cast %54 : vector<1x64x32xf32> to vector<64x32xf32>
    %cst_42 = arith.constant dense<0.000000e+00> : vector<64x256xf32>
    %56 = tpu.matmul %55, %53, %cst_42 {dimension_numbers = #tpu.dot_dimension_numbers<[1], [0], [0], [1], [0, 0, 1, 1], [], []>} : vector<64x32xf32>, vector<32x256xf32>, vector<64x256xf32> -> vector<64x256xf32>
    %57 = arith.addf %48, %56 : vector<64x256xf32>
    %c241_i32 = arith.constant 241 : i32
    %58 = tpu.dynamic_rotate %0 by %c241_i32 dim 1 : vector<32x256xf32>, i32 -> vector<32x256xf32>
    %c6 = arith.constant 6 : index
    %c0_43 = arith.constant 0 : index
    %c0_44 = arith.constant 0 : index
    %59 = vector.load %arg5[%c6, %c0_43, %c0_44] : memref<9x1x256xf32, #tpu.memory_space<vmem>>, vector<1x1x256xf32>
    %60 = vector.shape_cast %59 : vector<1x1x256xf32> to vector<1x256xf32>
    %61 = vector.broadcast %60 : vector<1x256xf32> to vector<32x256xf32>
    %62 = arith.mulf %58, %61 : vector<32x256xf32>
    %c6_45 = arith.constant 6 : index
    %c0_46 = arith.constant 0 : index
    %c0_47 = arith.constant 0 : index
    %63 = vector.load %arg3[%c6_45, %c0_46, %c0_47] : memref<9x64x32xf32, #tpu.memory_space<vmem>>, vector<1x64x32xf32>
    %64 = vector.shape_cast %63 : vector<1x64x32xf32> to vector<64x32xf32>
    %cst_48 = arith.constant dense<0.000000e+00> : vector<64x256xf32>
    %65 = tpu.matmul %64, %62, %cst_48 {dimension_numbers = #tpu.dot_dimension_numbers<[1], [0], [0], [1], [0, 0, 1, 1], [], []>} : vector<64x32xf32>, vector<32x256xf32>, vector<64x256xf32> -> vector<64x256xf32>
    %66 = arith.addf %57, %65 : vector<64x256xf32>
    %c240_i32 = arith.constant 240 : i32
    %67 = tpu.dynamic_rotate %0 by %c240_i32 dim 1 : vector<32x256xf32>, i32 -> vector<32x256xf32>
    %c7 = arith.constant 7 : index
    %c0_49 = arith.constant 0 : index
    %c0_50 = arith.constant 0 : index
    %68 = vector.load %arg5[%c7, %c0_49, %c0_50] : memref<9x1x256xf32, #tpu.memory_space<vmem>>, vector<1x1x256xf32>
    %69 = vector.shape_cast %68 : vector<1x1x256xf32> to vector<1x256xf32>
    %70 = vector.broadcast %69 : vector<1x256xf32> to vector<32x256xf32>
    %71 = arith.mulf %67, %70 : vector<32x256xf32>
    %c7_51 = arith.constant 7 : index
    %c0_52 = arith.constant 0 : index
    %c0_53 = arith.constant 0 : index
    %72 = vector.load %arg3[%c7_51, %c0_52, %c0_53] : memref<9x64x32xf32, #tpu.memory_space<vmem>>, vector<1x64x32xf32>
    %73 = vector.shape_cast %72 : vector<1x64x32xf32> to vector<64x32xf32>
    %cst_54 = arith.constant dense<0.000000e+00> : vector<64x256xf32>
    %74 = tpu.matmul %73, %71, %cst_54 {dimension_numbers = #tpu.dot_dimension_numbers<[1], [0], [0], [1], [0, 0, 1, 1], [], []>} : vector<64x32xf32>, vector<32x256xf32>, vector<64x256xf32> -> vector<64x256xf32>
    %75 = arith.addf %66, %74 : vector<64x256xf32>
    %c239_i32 = arith.constant 239 : i32
    %76 = tpu.dynamic_rotate %0 by %c239_i32 dim 1 : vector<32x256xf32>, i32 -> vector<32x256xf32>
    %c8 = arith.constant 8 : index
    %c0_55 = arith.constant 0 : index
    %c0_56 = arith.constant 0 : index
    %77 = vector.load %arg5[%c8, %c0_55, %c0_56] : memref<9x1x256xf32, #tpu.memory_space<vmem>>, vector<1x1x256xf32>
    %78 = vector.shape_cast %77 : vector<1x1x256xf32> to vector<1x256xf32>
    %79 = vector.broadcast %78 : vector<1x256xf32> to vector<32x256xf32>
    %80 = arith.mulf %76, %79 : vector<32x256xf32>
    %c8_57 = arith.constant 8 : index
    %c0_58 = arith.constant 0 : index
    %c0_59 = arith.constant 0 : index
    %81 = vector.load %arg3[%c8_57, %c0_58, %c0_59] : memref<9x64x32xf32, #tpu.memory_space<vmem>>, vector<1x64x32xf32>
    %82 = vector.shape_cast %81 : vector<1x64x32xf32> to vector<64x32xf32>
    %cst_60 = arith.constant dense<0.000000e+00> : vector<64x256xf32>
    %83 = tpu.matmul %82, %80, %cst_60 {dimension_numbers = #tpu.dot_dimension_numbers<[1], [0], [0], [1], [0, 0, 1, 1], [], []>} : vector<64x32xf32>, vector<32x256xf32>, vector<64x256xf32> -> vector<64x256xf32>
    %84 = arith.addf %75, %83 : vector<64x256xf32>
    %c0_61 = arith.constant 0 : index
    %c0_62 = arith.constant 0 : index
    %85 = vector.load %arg6[%c0_61, %c0_62] : memref<64x1xf32, #tpu.memory_space<vmem>>, vector<64x1xf32>
    %86 = vector.broadcast %85 : vector<64x1xf32> to vector<64x256xf32>
    %87 = arith.addf %84, %86 : vector<64x256xf32>
    %c0_63 = arith.constant 0 : index
    %c0_64 = arith.constant 0 : index
    %88 = vector.load %arg7[%c0_63, %c0_64] : memref<64x256xf32, #tpu.memory_space<vmem>>, vector<64x256xf32>
    tpu.vector_store %arg7[%c0_63, %c0_64], %87 {strides = array<i32>} : memref<64x256xf32, #tpu.memory_space<vmem>>, vector<64x256xf32>,
    return
  }
  func.func @transform_0(%arg0: i32) -> (i32, i32) {
    %c0_i32 = arith.constant 0 : i32
    %c0_i32_0 = arith.constant 0 : i32
    return %arg0, %c0_i32 : i32, i32
  }
  func.func @transform_1(%arg0: i32) -> (i32, i32) {
    %c0_i32 = arith.constant 0 : i32
    %c0_i32_0 = arith.constant 0 : i32
    %c0_i32_1 = arith.constant 0 : i32
    return %c0_i32, %c0_i32_0 : i32, i32
  }
  func.func @transform_2(%arg0: i32) -> (i32, i32, i32) {
    %c0_i32 = arith.constant 0 : i32
    %c0_i32_0 = arith.constant 0 : i32
    %c0_i32_1 = arith.constant 0 : i32
    %c0_i32_2 = arith.constant 0 : i32
    return %c0_i32, %c0_i32_0, %c0_i32_1 : i32, i32, i32
  }
  func.func @transform_3(%arg0: i32) -> (i32, i32) {
    %c0_i32 = arith.constant 0 : i32
    %c0_i32_0 = arith.constant 0 : i32
    %c0_i32_1 = arith.constant 0 : i32
    return %c0_i32, %c0_i32_0 : i32, i32
  }
  func.func @transform_4(%arg0: i32) -> (i32, i32, i32) {
    %c0_i32 = arith.constant 0 : i32
    %c0_i32_0 = arith.constant 0 : i32
    %c0_i32_1 = arith.constant 0 : i32
    %c0_i32_2 = arith.constant 0 : i32
    return %c0_i32, %c0_i32_0, %c0_i32_1 : i32, i32, i32
  }
  func.func @transform_5(%arg0: i32) -> (i32, i32) {
    %c0_i32 = arith.constant 0 : i32
    %c0_i32_0 = arith.constant 0 : i32
    %c0_i32_1 = arith.constant 0 : i32
    return %c0_i32, %c0_i32_0 : i32, i32
  }
  func.func @transform_6(%arg0: i32) -> (i32, i32) {
    %c0_i32 = arith.constant 0 : i32
    %c0_i32_0 = arith.constant 0 : i32
    return %arg0, %c0_i32 : i32, i32
  }
}

</mosaic_0001>

<bundles_post_ra>
// kernel: tpu_custom_call.1
= control target key start
LH: loop header
LB: loop body
LE: loop exit
PB: predicated region body
PF: predicated region fallthrough
CT: control target
= control target key end

     0   :  { %11 = vsyncpa [#allocation3], 0  ;;  %s4420_s0 = inlined_call_operand.vmem [shape: f32[64,256], index: 0, kind: input, shape index: {}]   ;;  %s4421_s1 = inlined_call_operand.vmem [shape: f32[256,256], index: 1, kind: input, shape index: {}]   ;;  %s4422_s2 = inlined_call_operand.vmem [shape: f32[9,64,32], index: 2, kind: input, shape index: {}]   ;;  %s4423_s3 = inlined_call_operand.vmem [shape: f32[64,32], index: 3, kind: input, shape index: {}]   ;;  %s4424_s4 = inlined_call_operand.vmem [shape: f32[9,1,256], index: 4, kind: input, shape index: {}]   ;;  %s4425_s5 = inlined_call_operand.vmem [shape: f32[64,1], index: 5, kind: input, shape index: {}]   ;;  %s4426_s6 = inlined_call_operand.hbm [shape: f32[128,256], index: 6, kind: output, shape index: {}]  }
   0x1   :  { %13 = vsyncpa [#allocation3 + $0x1], 0  ;;  %s3175_s21 = smov 0   ;;  %s3177_s22 = smov 0  }
   0x2   :  { %s3179_s23 = smov 0   ;;  %s3181_s24 = smov 0  }
   0x3 LB: > { %s3196_s25 = sadd.s32 4294967295, %s3126_s24   ;;  %s2551_s26 = sadd.s32 4294967294, %s3126_s24   ;;  %s3126_s24 = sphi %s3181_s24, %s4432_s24   ;;  %s3122_s23 = sphi %s3179_s23, %s4431_s23   ;;  %s3118_s22 = sphi %s3177_s22, %s4430_s22   ;;  %s3114_s21 = sphi %s3175_s21, %s4429_s21  }
   0x4   : > { %s3200_s27 = sadd.s32 1, %s3126_s24   ;;  %s157_s28 = sadd.s32 1, %s3122_s23 }
   0x5   : > { %s154_s29 = ssub.s32 %s3126_s24, %s3200_s27  ;;  %p167_p0 = scmp.ne.s32.totalorder %s3122_s23, %s3118_s22 }
   0x6   : > { %p155_p1 = scmp.eq.s32.totalorder %s154_s29, 0  ;;  %p168_p2 = scmp.eq.s32.totalorder %s3196_s25, 1 }
   0x7   : > { %p173_p3 = scmp.ne.s32.totalorder %s3118_s22, %s3114_s21  ;;  %p174_p4 = scmp.eq.s32.totalorder %s2551_s26, 1 }
   0x8   : > { %s3211_s30 = scalar_select %p155_p1, %s3122_s23, %s157_s28  }
   0x9   : > { %p3213_p5 = por %p168_p2, %p167_p0  ;;  %p3217_p6 = por %p174_p4, %p173_p3 }
   0xa   : > { %p2554_p7 = scmp.ge.s32.totalorder %s3126_s24, 1  ;;  %p217_p8 = scmp.lt.s32.totalorder %s3126_s24, 3 }
   0xc   : > { %p218_p9 = pnand %p2554_p7, %p217_p8 }
   0xd   : > { %v265_v0 = vld [vmem:[%s4421_s1 + $0x8] sm:$0xff] (!%p218_p9)  ;;  %v267_v1 = vld [vmem:[%s4421_s1 + $0x18] sm:$0xff] (!%p218_p9)  ;;  %v264_v2 = vld [vmem:[%s4421_s1] sm:$0xff] (!%p218_p9)  ;;  %s2556_s15 = sshll.u32 (!%p218_p9), %s3196_s25, 2  ;;  %s3128_s12 = smov (!%p218_p9), 15   ;;  %v3129_v37 = vmov (!%p218_p9), 0.0  }
   0xe   : > { %221 = sbr.rel (%p218_p9) target bundleno = 633 (0x279), region = 44  ;;  %v2720_v3 = vpack.c.bf16 (!%p218_p9), %v267_v1, %v265_v0  ;;  %v266_v4 = vld [vmem:[%s4421_s1 + $0x10] sm:$0xff] (!%p218_p9)  ;;  %v269_v5 = vld [vmem:[%s4421_s1 + $0x28] sm:$0xff] (!%p218_p9)  ;;  %v271_v6 = vld [vmem:[%s4421_s1 + $0x38] sm:$0xff] (!%p218_p9)  ;;  %p249_p10 = scmp.lt.s32.totalorder (!%p218_p9), %s2556_s15, 7  ;;  %1106 = vmatprep.mubr.f32.mxu1 (!%p218_p9), %v3129_v37  ;;  %vm480_vm2 = vcmask (!%p218_p9), 261120  }
   0xf   : > { %v2722_v7 = vpack.c.bf16 (!%p218_p9), %v266_v4, %v264_v2  ;;  %v2724_v8 = vpack.c.bf16 (!%p218_p9), %v271_v6, %v269_v5  ;;  %v268_v9 = vld [vmem:[%s4421_s1 + $0x20] sm:$0xff] (!%p218_p9)  ;;  %v270_v10 = vld [vmem:[%s4421_s1 + $0x30] sm:$0xff] (!%p218_p9)  ;;  %v273_v11 = vld [vmem:[%s4421_s1 + $0x48] sm:$0xff] (!%p218_p9)  ;;  %s3131_s9 = smov (!%p218_p9), 17   ;;  %s3132_s11 = smov (!%p218_p9), 127  }
  0x10   : > { %2721 = vmatprep.subr.bf16.mxu0 (!%p218_p9), %v2720_v3  ;;  %v275_v12 = vld [vmem:[%s4421_s1 + $0x58] sm:$0xff] (!%p218_p9)  ;;  %v2726_v13 = vpack.c.bf16 (!%p218_p9), %v270_v10, %v268_v9  ;;  %v272_v15 = vld [vmem:[%s4421_s1 + $0x40] sm:$0xff] (!%p218_p9)  ;;  %v274_v16 = vld [vmem:[%s4421_s1 + $0x50] sm:$0xff] (!%p218_p9)  ;;  %s3133_s17 = smov (!%p218_p9), 113   ;;  %s3134_s18 = smov (!%p218_p9), 16  }
  0x11   : > { %2723 = vmatpush1.bf16.msra.mxu0 (!%p218_p9), %v2722_v7  ;;  %v2728_v14 = vpack.c.bf16 (!%p218_p9), %v275_v12, %v273_v11  ;;  %v277_v17 = vld [vmem:[%s4421_s1 + $0x68] sm:$0xff] (!%p218_p9)  ;;  %v279_v18 = vld [vmem:[%s4421_s1 + $0x78] sm:$0xff] (!%p218_p9)  ;;  %v2730_v21 = vpack.c.bf16 (!%p218_p9), %v274_v16, %v272_v15  ;;  %v276_v24 = vld [vmem:[%s4421_s1 + $0x60] sm:$0xff] (!%p218_p9)  ;;  %s3135_s19 = smov (!%p218_p9), 112   ;;  %s3136_s28 = smov (!%p218_p9), 111  }
  0x12   : > { %2725 = vmatprep.subr.bf16.mxu0 (!%p218_p9), %v2724_v8  ;;  %v2732_v23 = vpack.c.bf16 (!%p218_p9), %v279_v18, %v277_v17  ;;  %v278_v25 = vld [vmem:[%s4421_s1 + $0x70] sm:$0xff] (!%p218_p9)  ;;  %v281_v27 = vld [vmem:[%s4421_s1 + $0x88] sm:$0xff] (!%p218_p9)  ;;  %v283_v28 = vld [vmem:[%s4421_s1 + $0x98] sm:$0xff] (!%p218_p9)  ;;  %s3138_s13 = smov (!%p218_p9), [#allocation2]  }
  0x13   : > { %v2734_v29 = vpack.c.bf16 (!%p218_p9), %v278_v25, %v276_v24  ;;  %v2736_v31 = vpack.c.bf16 (!%p218_p9), %v283_v28, %v281_v27  ;;  %v280_v32 = vld [vmem:[%s4421_s1 + $0x80] sm:$0xff] (!%p218_p9)  ;;  %v282_v33 = vld [vmem:[%s4421_s1 + $0x90] sm:$0xff] (!%p218_p9)  ;;  %v285_v35 = vld [vmem:[%s4421_s1 + $0xa8] sm:$0xff] (!%p218_p9)  ;;  %s3068_s14 = sshll.u32 (!%p218_p9), %s3138_s13, 4  ;;  %s3069_s14 = int_to_ptr.vmem [resolvable:$false] %s3068_s14 }
  0x14   : > { %v287_v36 = vld [vmem:[%s4421_s1 + $0xb8] sm:$0xff] (!%p218_p9)  ;;  %v2738_v38 = vpack.c.bf16 (!%p218_p9), %v282_v33, %v280_v32  ;;  %v284_v41 = vld [vmem:[%s4421_s1 + $0xa0] sm:$0xff] (!%p218_p9)  ;;  %v286_v42 = vld [vmem:[%s4421_s1 + $0xb0] sm:$0xff] (!%p218_p9) }
  0x15   : > { %s4434_s15 = smov (!%p249_p10, %s2556_s15), 7  ;;  %2727 = vmatpush1.bf16.msra.mxu0 %v2726_v13  ;;  %v2740_v40 = vpack.c.bf16 %v287_v36, %v285_v35  ;;  %v289_v44 = vld [vmem:[%s4421_s1 + $0xc8] sm:$0xff]  ;;  %v291_v45 = vld [vmem:[%s4421_s1 + $0xd8] sm:$0xff]  ;;  %v2742_v46 = vpack.c.bf16 %v286_v42, %v284_v41  ;;  %v288_v48 = vld [vmem:[%s4421_s1 + $0xc0] sm:$0xff] }
  0x16   : > { %s2717_s16 = sshll.u32 %s4434_s15, 4  ;;  %2729 = vmatprep.subr.bf16.mxu0 %v2728_v14  ;;  %v2744_v47 = vpack.c.bf16 %v291_v45, %v289_v44  ;;  %v290_v49 = vld [vmem:[%s4421_s1 + $0xd0] sm:$0xff]  ;;  %v293_v50 = vld [vmem:[%s4421_s1 + $0xe8] sm:$0xff]  ;;  %v295_v51 = vld [vmem:[%s4421_s1 + $0xf8] sm:$0xff] }
  0x17   : > { %s3263_s29 = scalar_lea.vmem %s4420_s0, %s2717_s16  ;;  %v2746_v52 = vpack.c.bf16 %v290_v49, %v288_v48  ;;  %v2748_v53 = vpack.c.bf16 %v295_v51, %v293_v50  ;;  %v292_v54 = vld [vmem:[%s4421_s1 + $0xe0] sm:$0xff]  ;;  %v294_v55 = vld [vmem:[%s4421_s1 + $0xf0] sm:$0xff]  ;;  %v297_v56 = vld [vmem:[%s4421_s1 + $0x108] sm:$0xff]  ;;  %v441_v50 = vlaneseq }
  0x18   : > { %v3272_v19 = vld [vmem:[%s3263_s29 + $0x8] sm:$0xff]  ;;  %v3275_v20 = vld [vmem:[%s3263_s29] sm:$0xff]  ;;  %v3282_v22 = vld [vmem:[%s3263_s29 + $0x18] sm:$0xff]  ;;  %v2750_v58 = vpack.c.bf16 %v294_v55, %v292_v54 }
  0x19   : > { %971 = vrot.lane.b32.xlu1 %v3272_v19, %s3128_s12  ;;  %963 = vrot.lane.b32.xlu0 %v3275_v20, %s3128_s12  ;;  %v3291_v26 = vld [vmem:[%s3263_s29 + $0x10] sm:$0xff]  ;;  %v3314_v34 = vld [vmem:[%s3263_s29 + $0x20] sm:$0xff]  ;;  %v455_v51 = vshrl.u32 %v441_v50, 7 }
  0x1a   : > { %392 = vmatprep.mubr.f32.mxu0 %v3272_v19  ;;  %2731 = vmatpush1.bf16.msra.mxu0 %v2730_v21  ;;  %v3305_v30 = vld [vmem:[%s3263_s29 + $0x30] sm:$0xff]  ;;  %v3328_v39 = vld [vmem:[%s3263_s29 + $0x38] sm:$0xff]  ;;  %v3337_v43 = vld [vmem:[%s3263_s29 + $0x28] sm:$0xff] }
  0x1b   : > { %2733 = vmatprep.subr.bf16.mxu0 %v2732_v23  ;;  %v299_v57 = vld [vmem:[%s4421_s1 + $0x118] sm:$0xff]  ;;  %v296_v60 = vld [vmem:[%s4421_s1 + $0x100] sm:$0xff]  ;;  %v298_v61 = vld [vmem:[%s4421_s1 + $0x110] sm:$0xff]  ;;  %v3547_v54 = vsub.s32 1, %v455_v51 }
  0x1c   : > { %v2752_v59 = vpack.c.bf16 %v299_v57, %v297_v56  ;;  %v301_v62 = vld [vmem:[%s4421_s1 + $0x128] sm:$0xff]  ;;  %v303_v63 = vld [vmem:[%s4421_s1 + $0x138] sm:$0xff]  ;;  %v2754_v0 = vpack.c.bf16 %v298_v61, %v296_v60  ;;  %v300_v2 = vld [vmem:[%s4421_s1 + $0x120] sm:$0xff] }
  0x1d   : > { %973 = vrot.lane.b32.xlu1 %v3282_v22, %s3128_s12  ;;  %965 = vrot.lane.b32.xlu0 %v3291_v26, %s3128_s12  ;;  %v2756_v1 = vpack.c.bf16 %v303_v63, %v301_v62  ;;  %v302_v3 = vld [vmem:[%s4421_s1 + $0x130] sm:$0xff]  ;;  %v305_v4 = vld [vmem:[%s4421_s1 + $0x148] sm:$0xff] }
  0x1e   : > { %2735 = vmatpush1.bf16.msra.mxu0 %v2734_v29  ;;  %v307_v5 = vld [vmem:[%s4421_s1 + $0x158] sm:$0xff]  ;;  %v2758_v6 = vpack.c.bf16 %v302_v3, %v300_v2  ;;  %v304_v8 = vld [vmem:[%s4421_s1 + $0x140] sm:$0xff]  ;;  %v306_v9 = vld [vmem:[%s4421_s1 + $0x150] sm:$0xff] }
  0x1f   : > { %2737 = vmatprep.subr.bf16.mxu0 %v2736_v31  ;;  %v2760_v7 = vpack.c.bf16 %v307_v5, %v305_v4  ;;  %v309_v10 = vld [vmem:[%s4421_s1 + $0x168] sm:$0xff]  ;;  %v311_v11 = vld [vmem:[%s4421_s1 + $0x178] sm:$0xff]  ;;  %v2762_v12 = vpack.c.bf16 %v306_v9, %v304_v8  ;;  %v308_v14 = vld [vmem:[%s4421_s1 + $0x160] sm:$0xff] }
  0x20   : > { %v2764_v13 = vpack.c.bf16 %v311_v11, %v309_v10  ;;  %v310_v15 = vld [vmem:[%s4421_s1 + $0x170] sm:$0xff]  ;;  %v313_v16 = vld [vmem:[%s4421_s1 + $0x188] sm:$0xff]  ;;  %v315_v17 = vld [vmem:[%s4421_s1 + $0x198] sm:$0xff] }
  0x21   : > { %969 = vrot.lane.b32.xlu1 %v3305_v30, %s3128_s12  ;;  %967 = vrot.lane.b32.xlu0 %v3314_v34, %s3128_s12  ;;  %v2766_v18 = vpack.c.bf16 %v310_v15, %v308_v14  ;;  %v2768_v21 = vpack.c.bf16 %v315_v17, %v313_v16  ;;  %v312_v23 = vld [vmem:[%s4421_s1 + $0x180] sm:$0xff]  ;;  %v314_v24 = vld [vmem:[%s4421_s1 + $0x190] sm:$0xff] }
  0x22   : > { %2739 = vmatpush1.bf16.msra.mxu0 %v2738_v38  ;;  %v317_v25 = vld [vmem:[%s4421_s1 + $0x1a8] sm:$0xff]  ;;  %v319_v27 = vld [vmem:[%s4421_s1 + $0x1b8] sm:$0xff]  ;;  %v2770_v28 = vpack.c.bf16 %v314_v24, %v312_v23  ;;  %v316_v31 = vld [vmem:[%s4421_s1 + $0x1a0] sm:$0xff] }
  0x23   : > { %2741 = vmatprep.subr.bf16.mxu0 %v2740_v40  ;;  %v2772_v29 = vpack.c.bf16 %v319_v27, %v317_v25  ;;  %v318_v32 = vld [vmem:[%s4421_s1 + $0x1b0] sm:$0xff]  ;;  %v321_v33 = vld [vmem:[%s4421_s1 + $0x1c8] sm:$0xff]  ;;  %v323_v35 = vld [vmem:[%s4421_s1 + $0x1d8] sm:$0xff] }
  0x24   : > { %v2774_v36 = vpack.c.bf16 %v318_v32, %v316_v31  ;;  %v2776_v38 = vpack.c.bf16 %v323_v35, %v321_v33  ;;  %v320_v40 = vld [vmem:[%s4421_s1 + $0x1c0] sm:$0xff]  ;;  %v322_v41 = vld [vmem:[%s4421_s1 + $0x1d0] sm:$0xff]  ;;  %v325_v42 = vld [vmem:[%s4421_s1 + $0x1e8] sm:$0xff] }
  0x25   : > { %977 = vrot.lane.b32.xlu1 %v3328_v39, %s3128_s12  ;;  %975 = vrot.lane.b32.xlu0 %v3337_v43, %s3128_s12  ;;  %s3130_s12 = smov 1   ;;  %v327_v44 = vld [vmem:[%s4421_s1 + $0x1f8] sm:$0xff]  ;;  %v2778_v45 = vpack.c.bf16 %v322_v41, %v320_v40  ;;  %v326_v48 = vld [vmem:[%s4421_s1 + $0x1f0] sm:$0xff] }
  0x26   : > { %2743 = vmatpush1.bf16.msra.mxu0 %v2742_v46  ;;  %v2780_v46 = vpack.c.bf16 %v327_v44, %v325_v42  ;;  %v2592_v55 = vld [vmem:[%s4424_s4 + $0x4] sm:$0x3]  ;;  %v2609_v23 = vld [vmem:[%s4424_s4 + $0x6] sm:$0x3] }
  0x27   : > { %2745 = vmatprep.subr.bf16.mxu0 %v2744_v47  ;;  %v324_v47 = vld [vmem:[%s4421_s1 + $0x1e0] sm:$0xff]  ;;  %v1206_v31 = vrot.slane %v2609_v23, %v3547_v54 }
  0x28   : > { %v2782_v49 = vpack.c.bf16 %v326_v48, %v324_v47  ;;  %v2593_v32 = vld [vmem:[%s4422_s2 + $0x80] sm:$0xff]  ;;  %v2594_v48 = vld [vmem:[%s4422_s2 + $0x88] sm:$0xff] }
  0x29   : > { %1173 = vrot.lane.b32.xlu1 %v3291_v26, %s3130_s12  ;;  %1171 = vrot.lane.b32.xlu0 %v3275_v20, %s3130_s12 }
  0x2a   : > { %2747 = vmatpush1.bf16.msra.mxu0 %v2746_v52  ;;  %v3542_v52 = vand.u32 127, %v441_v50 }
  0x2b   : > { %2749 = vmatprep.subr.bf16.mxu0 %v2748_v53  ;;  %v3545_v53 = vsub.s32 0, %v455_v51 }
  0x2c   : > { %vm979_vm0 = vcmp.lt.s32.totalorder %v3542_v52, 15  ;;  %vm1187_vm1 = vcmp.lt.s32.totalorder %v3542_v52, 1  ;;  %vm443_vm3 = vcmp.lt.s32.totalorder %v3542_v52, 17  ;;  %vm1578_vm4 = vcmp.lt.s32.totalorder %v3542_v52, 127 }
  0x2d   : > { %1181 = vrot.lane.b32.xlu1 %v3282_v22, %s3130_s12  ;;  %1179 = vrot.lane.b32.xlu0 %v3272_v19, %s3130_s12  ;;  %v994_v57 = vrot.slane %v2592_v55, %v3545_v53  ;;  %vm1786_vm5 = vcmp.lt.s32.totalorder %v3542_v52, 113  ;;  %vm771_vm6 = vcmp.lt.s32.totalorder %v3542_v52, 16  ;;  %vm1994_vm7 = vcmp.lt.s32.totalorder %v3542_v52, 112 }
  0x2e   : > { %2751 = vmatpush1.bf16.msra.mxu0 %v2750_v58  ;;  %vm2202_vm8 = vcmp.lt.s32.totalorder %v3542_v52, 111 }
  0x2f   : > { %2753 = vmatprep.subr.bf16.mxu0 %v2752_v59  ;;  %v998_v59 = vrot.slane %v2592_v55, %v3547_v54 }
  0x31   : > { %1177 = vrot.lane.b32.xlu1 %v3305_v30, %s3130_s12  ;;  %1175 = vrot.lane.b32.xlu0 %v3314_v34, %s3130_s12 }
  0x32   : > { %2755 = vmatpush1.bf16.msra.mxu0 %v2754_v0 }
  0x33   : > { %2757 = vmatprep.subr.bf16.mxu0 %v2756_v1 }
  0x35   : > { %1185 = vrot.lane.b32.xlu1 %v3328_v39, %s3130_s12  ;;  %1183 = vrot.lane.b32.xlu0 %v3337_v43, %s3130_s12 }
  0x36   : > { %2759 = vmatpush1.bf16.msra.mxu0 %v2758_v6 }
  0x37   : > { %2761 = vmatprep.subr.bf16.mxu0 %v2760_v7 }
  0x39   : > { %427 = vrot.lane.b32.xlu1 %v3291_v26, %s3131_s9  ;;  %425 = vrot.lane.b32.xlu0 %v3275_v20, %s3131_s9 }
  0x3a   : > { %2763 = vmatpush1.bf16.msra.mxu0 %v2762_v12 }
  0x3b   : > { %2765 = vmatprep.subr.bf16.mxu0 %v2764_v13 }
  0x3d   : > { %435 = vrot.lane.b32.xlu1 %v3282_v22, %s3131_s9  ;;  %433 = vrot.lane.b32.xlu0 %v3272_v19, %s3131_s9 }
  0x3e   : > { %2767 = vmatpush1.bf16.msra.mxu0 %v2766_v18 }
  0x3f   : > { %2769 = vmatprep.subr.bf16.mxu0 %v2768_v21 }
  0x41   : > { %431 = vrot.lane.b32.xlu1 %v3305_v30, %s3131_s9  ;;  %429 = vrot.lane.b32.xlu0 %v3314_v34, %s3131_s9 }
  0x42   : > { %2771 = vmatpush1.bf16.msra.mxu0 %v2770_v28 }
  0x43   : > { %2773 = vmatprep.subr.bf16.mxu0 %v2772_v29  ;;  %v1202_v29 = vrot.slane %v2609_v23, %v3545_v53 }
  0x45   : > { %439 = vrot.lane.b32.xlu1 %v3328_v39, %s3131_s9  ;;  %437 = vrot.lane.b32.xlu0 %v3337_v43, %s3131_s9  ;;  %s3070_s9 = scalar_lea.vmem %s3069_s14, 4096 }
  0x46   : > { %2775 = vmatpush1.bf16.msra.mxu0 %v2774_v36 }
  0x47   : > { %2777 = vmatprep.subr.bf16.mxu0 %v2776_v38 }
  0x49   : > { %1564 = vrot.lane.b32.xlu1 %v3291_v26, %s3132_s11  ;;  %1562 = vrot.lane.b32.xlu0 %v3275_v20, %s3132_s11 }
  0x4a   : > { %2779 = vmatpush1.bf16.msra.mxu0 %v2778_v45  ;;  %v3599_v45 = vld [vmem:[%s4424_s4 + $0x8] sm:$0x3] }
  0x4b   : > { %2781 = vmatprep.subr.bf16.mxu0 %v2780_v46 }
  0x4d   : > { %1572 = vrot.lane.b32.xlu1 %v3282_v22, %s3132_s11  ;;  %1570 = vrot.lane.b32.xlu0 %v3272_v19, %s3132_s11 }
  0x4e   : > { %2783 = vmatpush1.bf16.msra.mxu0 %v2782_v49 }
  0x51   : > { %1568 = vrot.lane.b32.xlu1 %v3305_v30, %s3132_s11  ;;  %1566 = vrot.lane.b32.xlu0 %v3314_v34, %s3132_s11 }
  0x52   : > { %393 = vmatmul.mubr.f32.vlgmr.msra.gmra.mrb[0].mxu0 %v3275_v20 }
  0x53   : > { %398 = vmatprep.mubr.f32.mxu0 %v3282_v22 }
  0x55   : > { %1576 = vrot.lane.b32.xlu1 %v3328_v39, %s3132_s11  ;;  %1574 = vrot.lane.b32.xlu0 %v3337_v43, %s3132_s11 }
  0x56   : > { %399 = vmatmul.mubr.f32.gmra.mrb[2].mxu0 %v3291_v26 }
  0x57   : > { %404 = vmatprep.mubr.f32.mxu0 %v3337_v43 }
  0x59   : > { %1772 = vrot.lane.b32.xlu1 %v3291_v26, %s3133_s17  ;;  %1770 = vrot.lane.b32.xlu0 %v3275_v20, %s3133_s17 }
  0x5a   : > { %405 = vmatmul.mubr.f32.gmra.mrb[4].mxu0 %v3314_v34 }
  0x5b   : > { %410 = vmatprep.mubr.f32.mxu0 %v3328_v39 }
  0x5d   : > { %1780 = vrot.lane.b32.xlu1 %v3282_v22, %s3133_s17  ;;  %1778 = vrot.lane.b32.xlu0 %v3272_v19, %s3133_s17 }
  0x5e   : > { %411 = vmatmul.mubr.f32.gmra.mrb[6].mxu0 %v3305_v30 }
  0x5f   : > { %569 = vmatprep.mubr.f32.mxu0 %v3129_v37 }
  0x61   : > { %1776 = vrot.lane.b32.xlu1 %v3305_v30, %s3133_s17  ;;  %1774 = vrot.lane.b32.xlu0 %v3314_v34, %s3133_s17 }
  0x65   : > { %1784 = vrot.lane.b32.xlu1 %v3328_v39, %s3133_s17  ;;  %1782 = vrot.lane.b32.xlu0 %v3337_v43, %s3133_s17 }
  0x69   : > { %757 = vrot.lane.b32.xlu1 %v3291_v26, %s3134_s18  ;;  %755 = vrot.lane.b32.xlu0 %v3275_v20, %s3134_s18 }
  0x6d   : > { %765 = vrot.lane.b32.xlu1 %v3282_v22, %s3134_s18  ;;  %763 = vrot.lane.b32.xlu0 %v3272_v19, %s3134_s18 }
  0x71   : > { %761 = vrot.lane.b32.xlu1 %v3305_v30, %s3134_s18  ;;  %759 = vrot.lane.b32.xlu0 %v3314_v34, %s3134_s18 }
  0x75   : > { %769 = vrot.lane.b32.xlu1 %v3328_v39, %s3134_s18  ;;  %767 = vrot.lane.b32.xlu0 %v3337_v43, %s3134_s18 }
  0x79   : > { %1980 = vrot.lane.b32.xlu1 %v3291_v26, %s3135_s19  ;;  %1978 = vrot.lane.b32.xlu0 %v3275_v20, %s3135_s19 }
  0x7d   : > { %1988 = vrot.lane.b32.xlu1 %v3282_v22, %s3135_s19  ;;  %1986 = vrot.lane.b32.xlu0 %v3272_v19, %s3135_s19 }
  0x81   : > { %1984 = vrot.lane.b32.xlu1 %v3305_v30, %s3135_s19  ;;  %1982 = vrot.lane.b32.xlu0 %v3314_v34, %s3135_s19 }
  0x85   : > { %1992 = vrot.lane.b32.xlu1 %v3328_v39, %s3135_s19  ;;  %1990 = vrot.lane.b32.xlu0 %v3337_v43, %s3135_s19  ;;  %s245_s19 = sand.u32 1, %s3118_s22  }
  0x86   : > { %s2555_s20 = sshll.u32 %s245_s19, 7 }
  0x87   : > { %s4343_s26 = scalar_lea.vmem [#allocation2], %s2555_s20 }
  0x88   : > { %s2489_s10 = sshll.u32 %s4343_s26, 4  ;;  %s4372_s10 = int_to_ptr.vmem [resolvable:$true] %s2489_s10 }
  0x89   : > { %2188 = vrot.lane.b32.xlu1 %v3291_v26, %s3136_s28  ;;  %2186 = vrot.lane.b32.xlu0 %v3275_v20, %s3136_s28  ;;  %s3064_s11 = scalar_lea.vmem %s4372_s10, 2048  ;;  %p3071_p0 = scmp.lt.s32.totalorder %s4372_s10, %s3069_s14 }
  0x8a   : > { %p3065_p11 = scmp.ne.s32.totalorder %s4372_s10, %s3064_s11  ;;  %p3072_p1 = scmp.lt.s32.totalorder %s3070_s9, %s3064_s11 }
  0x8b   : > { %v972_v56 = vpop.permute.xlu1 %971  ;;  %v964_v58 = vpop.permute.xlu0 %963 }
  0x8c   : > { %v980_v60 = vsel %vm979_vm0, %v964_v58, %v972_v56  ;;  %v984_v61 = vsel %vm979_vm0, %v972_v56, %v964_v58  ;;  %v3608_v56 = vrot.slane %v3599_v45, %v3547_v54  ;;  %p3066_p12 = pnand %p3065_p11, %p3213_p5  ;;  %p3073_p2 = por %p3072_p1, %p3071_p0 }
  0x8d   : > { %2196 = vrot.lane.b32.xlu1 %v3282_v22, %s3136_s28  ;;  %2194 = vrot.lane.b32.xlu0 %v3272_v19, %s3136_s28  ;;  %v1001_v63 = vmul.f32 %v994_v57, %v984_v61  ;;  %v1002_v1 = vmul.f32 %v998_v59, %v980_v60 }
  0x8e   : > { %p3067_p13 = pneg %p3066_p12 }
  0x8f   : > { %v974_v62 = vpop.permute.xlu1 %973  ;;  %v966_v0 = vpop.permute.xlu0 %965 }
  0x90   : > { %v981_v2 = vsel %vm979_vm0, %v966_v0, %v974_v62  ;;  %v985_v3 = vsel %vm979_vm0, %v974_v62, %v966_v0  ;;  %v1393_v62 = vmul.f32 %v3608_v56, %v3272_v19  ;;  %v2596_v19 = vld [vmem:[%s4422_s2 + $0x98] sm:$0xff]  ;;  %p3074_p3 = pnand %p3073_p2, %p3067_p13 }
  0x91   : > { %2192 = vrot.lane.b32.xlu1 %v3305_v30, %s3136_s28  ;;  %v1003_v4 = vmul.f32 %v994_v57, %v985_v3  ;;  %v1004_v5 = vmul.f32 %v998_v59, %v981_v2  ;;  %2190 = vrot.lane.b32.xlu0 %v3314_v34, %s3136_s28 }
  0x93   : > { %v970_v6 = vpop.permute.xlu1 %969  ;;  %v968_v7 = vpop.permute.xlu0 %967  ;;  %v2808_v8 = vpack.c.bf16 %v1004_v5, %v1002_v1  ;;  %v2810_v9 = vpack.c.bf16 %v1003_v4, %v1001_v63  ;;  %v1395_v63 = vmul.f32 %v3608_v56, %v3282_v22 }
  0x95   : > { %2200 = vrot.lane.b32.xlu1 %v3328_v39, %s3136_s28  ;;  %2809 = vmatprep.subr.bf16.mxu1 %v2808_v8 }
  0x96   : > { %2198 = vrot.lane.b32.xlu0 %v3337_v43, %s3136_s28  ;;  %2811 = vmatpush1.bf16.msra.mxu1 %v2810_v9  ;;  %v2824_v9 = vpack.c.bf16 %v1395_v63, %v1393_v62  ;;  %s2719_s28 = sshll.u32 %s3196_s25, 11  ;;  %s4378_s25 = scalar_lea.sflag [#allocation3], %s245_s19 }
  0x97   : > { %v978_v10 = vpop.permute.xlu1 %977  ;;  %v976_v13 = vpop.permute.xlu0 %975  ;;  %s4370_s15 = scalar_lea.hbm %s4426_s6, %s2719_s28 }
  0x98   : > { %v983_v11 = vsel %vm979_vm0, %v970_v6, %v978_v10  ;;  %v987_v12 = vsel %vm979_vm0, %v978_v10, %v970_v6  ;;  %v982_v16 = vsel %vm979_vm0, %v968_v7, %v976_v13  ;;  %v986_v17 = vsel %vm979_vm0, %v976_v13, %v968_v7  ;;  %v452_v6 = vld [vmem:[%s4424_s4] sm:$0x3] }
  0x99   : > { %v1007_v14 = vmul.f32 %v994_v57, %v987_v12  ;;  %v1008_v15 = vmul.f32 %v998_v59, %v983_v11  ;;  %v1005_v18 = vmul.f32 %v994_v57, %v986_v17  ;;  %v1006_v21 = vmul.f32 %v998_v59, %v982_v16  ;;  %v2595_v57 = vld [vmem:[%s4422_s2 + $0x90] sm:$0xff]  ;;  %v2597_v13 = vld [vmem:[%s4422_s2 + $0xa0] sm:$0xff] }
  0x9a   : > { %v457_v11 = vrot.slane %v452_v6, %v3545_v53  ;;  %v461_v12 = vrot.slane %v452_v6, %v3547_v54  ;;  %v2611_v6 = vld [vmem:[%s4422_s2 + $0xc8] sm:$0xff] }
  0x9b   : > { %v1174_v24 = vpop.permute.xlu1 %1173  ;;  %v2812_v25 = vpack.c.bf16 %v1008_v15, %v1006_v21  ;;  %v2814_v27 = vpack.c.bf16 %v1007_v14, %v1005_v18  ;;  %v1172_v28 = vpop.permute.xlu0 %1171 }
  0x9d   : > { %2813 = vmatprep.subr.bf16.mxu1 %v2812_v25 }
  0x9e   : > { %2815 = vmatpush1.bf16.msra.mxu1 %v2814_v27 }
  0x9f   : > { %v1182_v33 = vpop.permute.xlu1 %1181  ;;  %v1180_v38 = vpop.permute.xlu0 %1179 }
  0xa0   : > { %v1189_v35 = vsel %vm1187_vm1, %v1174_v24, %v1182_v33  ;;  %v1193_v36 = vsel %vm1187_vm1, %v1182_v33, %v1174_v24  ;;  %v1188_v42 = vsel %vm1187_vm1, %v1172_v28, %v1180_v38  ;;  %v1192_v44 = vsel %vm1187_vm1, %v1180_v38, %v1172_v28  ;;  %v2598_v28 = vld [vmem:[%s4422_s2 + $0xa8] sm:$0xff] }
  0xa1   : > { %v1211_v40 = vmul.f32 %v1202_v29, %v1193_v36  ;;  %v1212_v41 = vmul.f32 %v1206_v31, %v1189_v35  ;;  %2601 = vmatmul.mubr.msk.f32.vlgmr.msra.gmra.mrb[0].mxu1 %vm480_vm2, %v2593_v32  ;;  %v1209_v46 = vmul.f32 %v1202_v29, %v1192_v44  ;;  %v1210_v47 = vmul.f32 %v1206_v31, %v1188_v42  ;;  %v2599_v35 = vld [vmem:[%s4422_s2 + $0xb0] sm:$0xff] }
  0xa2   : > { %1112 = vmatprep.mubr.f32.mxu1 %v3129_v37  ;;  %v1385_v36 = vrot.slane %v3599_v45, %v3545_v53 }
  0xa3   : > { %v1178_v49 = vpop.permute.xlu1 %1177  ;;  %v2818_v50 = vpack.c.bf16 %v1211_v40, %v1209_v46  ;;  %v1176_v51 = vpop.permute.xlu0 %1175  ;;  %v2816_v55 = vpack.c.bf16 %v1212_v41, %v1210_v47 }
  0xa5   : > { %2602 = vmatmul.mubr.msk.f32.gmra.mrb[2].mxu1 %vm480_vm2, %v2594_v48  ;;  %2817 = vmatprep.subr.bf16.mxu1 %v2816_v55  ;;  %v1392_v55 = vmul.f32 %v1385_v36, %v3275_v20  ;;  %v2610_v20 = vld [vmem:[%s4422_s2 + $0xc0] sm:$0xff] }
  0xa6   : > { %1118 = vmatprep.mubr.f32.mxu1 %v3129_v37  ;;  %2819 = vmatpush1.bf16.msra.mxu1 %v2818_v50  ;;  %v3675_v50 = vld [vmem:[%s4424_s4 + $0xa] sm:$0x3] }
  0xa7   : > { %v1186_v58 = vpop.permute.xlu1 %1185  ;;  %v1184_v61 = vpop.permute.xlu0 %1183 }
  0xa8   : > { %v1191_v59 = vsel %vm1187_vm1, %v1178_v49, %v1186_v58  ;;  %v1195_v60 = vsel %vm1187_vm1, %v1186_v58, %v1178_v49  ;;  %v1190_v2 = vsel %vm1187_vm1, %v1176_v51, %v1184_v61  ;;  %v1194_v3 = vsel %vm1187_vm1, %v1184_v61, %v1176_v51  ;;  %v2600_v51 = vld [vmem:[%s4422_s2 + $0xb8] sm:$0xff] }
  0xa9   : > { %v1215_v0 = vmul.f32 %v1202_v29, %v1195_v60  ;;  %v1216_v1 = vmul.f32 %v1206_v31, %v1191_v59  ;;  %2603 = vmatmul.mubr.msk.f32.gmra.mrb[4].mxu1 %vm480_vm2, %v2595_v57  ;;  %v1213_v4 = vmul.f32 %v1202_v29, %v1194_v3  ;;  %v1214_v5 = vmul.f32 %v1206_v31, %v1190_v2 }
  0xaa   : > { %1124 = vmatprep.mubr.f32.mxu1 %v3129_v37  ;;  %v1394_v57 = vmul.f32 %v1385_v36, %v3291_v26  ;;  %v1397_v59 = vmul.f32 %v3608_v56, %v3337_v43  ;;  %v1399_v60 = vmul.f32 %v3608_v56, %v3328_v39  ;;  %v1396_v39 = vmul.f32 %v1385_v36, %v3314_v34 }
  0xab   : > { %v428_v22 = vpop.permute.xlu1 %427  ;;  %v2822_v7 = vpack.c.bf16 %v1215_v0, %v1213_v4  ;;  %v2820_v8 = vpack.c.bf16 %v1216_v1, %v1214_v5  ;;  %v426_v10 = vpop.permute.xlu0 %425  ;;  %v3694_v0 = vrot.slane %v3675_v50, %v3547_v54  ;;  %v1398_v43 = vmul.f32 %v1385_v36, %v3305_v30  ;;  %v472_v1 = vld [vmem:[%s4422_s2] sm:$0xff] }
  0xac   : > { %v2826_v26 = vpack.c.bf16 %v1394_v57, %v1392_v55  ;;  %v2828_v2 = vpack.c.bf16 %v1399_v60, %v1397_v59  ;;  %v479_v55 = vld [vmem:[%s4422_s2 + $0x38] sm:$0xff] }
  0xad   : > { %2604 = vmatmul.mubr.msk.f32.gmra.mrb[6].mxu1 %vm480_vm2, %v2596_v19  ;;  %2821 = vmatprep.subr.bf16.mxu1 %v2820_v8  ;;  %v2830_v19 = vpack.c.bf16 %v1398_v43, %v1396_v39 }
  0xae   : > { %1130 = vmatprep.mubr.f32.mxu1 %v3129_v37  ;;  %2823 = vmatpush1.bf16.msra.mxu1 %v2822_v7  ;;  %v473_v7 = vld [vmem:[%s4422_s2 + $0x8] sm:$0xff] }
  0xaf   : > { %v436_v14 = vpop.permute.xlu1 %435  ;;  %2825 = vmatprep.subr.bf16.mxu1 %v2824_v9  ;;  %v434_v17 = vpop.permute.xlu0 %433 }
  0xb0   : > { %v445_v15 = vsel %vm443_vm3, %v428_v22, %v436_v14  ;;  %v449_v16 = vsel %vm443_vm3, %v436_v14, %v428_v22  ;;  %v444_v23 = vsel %vm443_vm3, %v426_v10, %v434_v17  ;;  %v448_v24 = vsel %vm443_vm3, %v434_v17, %v426_v10  ;;  %v2612_v10 = vld [vmem:[%s4422_s2 + $0xd0] sm:$0xff]  ;;  %v2613_v14 = vld [vmem:[%s4422_s2 + $0xd8] sm:$0xff] }
  0xb1   : > { %v466_v18 = vmul.f32 %v457_v11, %v449_v16  ;;  %v467_v21 = vmul.f32 %v461_v12, %v445_v15  ;;  %2605 = vmatmul.mubr.msk.f32.gmra.mrb[8].mxu1 %vm480_vm2, %v2597_v13  ;;  %v464_v25 = vmul.f32 %v457_v11, %v448_v24  ;;  %v465_v27 = vmul.f32 %v461_v12, %v444_v23  ;;  %v475_v16 = vld [vmem:[%s4422_s2 + $0x18] sm:$0xff]  ;;  %v476_v23 = vld [vmem:[%s4422_s2 + $0x20] sm:$0xff] }
  0xb2   : > { %1136 = vmatprep.mubr.f32.mxu1 %v3129_v37 }
  0xb3   : > { %v432_v29 = vpop.permute.xlu1 %431  ;;  %v2786_v31 = vpack.c.bf16 %v466_v18, %v464_v25  ;;  %v430_v32 = vpop.permute.xlu0 %429  ;;  %v2784_v33 = vpack.c.bf16 %v467_v21, %v465_v27  ;;  %v2614_v18 = vld [vmem:[%s4422_s2 + $0xe0] sm:$0xff]  ;;  %v2615_v25 = vld [vmem:[%s4422_s2 + $0xe8] sm:$0xff] }
  0xb5   : > { %2606 = vmatmul.mubr.msk.f32.gmra.mrb[10].mxu1 %vm480_vm2, %v2598_v28  ;;  %2785 = vmatprep.subr.bf16.mxu0 %v2784_v33  ;;  %v477_v28 = vld [vmem:[%s4422_s2 + $0x28] sm:$0xff] }
  0xb6   : > { %1142 = vmatprep.mubr.f32.mxu1 %v3129_v37  ;;  %2787 = vmatpush1.bf16.msra.mxu0 %v2786_v31  ;;  %v1593_v31 = vrot.slane %v3675_v50, %v3545_v53 }
  0xb7   : > { %v440_v38 = vpop.permute.xlu1 %439  ;;  %v438_v42 = vpop.permute.xlu0 %437 }
  0xb8   : > { %v447_v40 = vsel %vm443_vm3, %v432_v29, %v440_v38  ;;  %v451_v41 = vsel %vm443_vm3, %v440_v38, %v432_v29  ;;  %v446_v47 = vsel %vm443_vm3, %v430_v32, %v438_v42  ;;  %v450_v48 = vsel %vm443_vm3, %v438_v42, %v430_v32  ;;  %v2616_v32 = vld [vmem:[%s4422_s2 + $0xf0] sm:$0xff] }
  0xb9   : > { %v470_v44 = vmul.f32 %v457_v11, %v451_v41  ;;  %v471_v46 = vmul.f32 %v461_v12, %v447_v40  ;;  %2607 = vmatmul.mubr.msk.f32.gmra.mrb[12].mxu1 %vm480_vm2, %v2599_v35  ;;  %v468_v45 = vmul.f32 %v457_v11, %v450_v48  ;;  %v469_v49 = vmul.f32 %v461_v12, %v446_v47  ;;  %v474_v12 = vld [vmem:[%s4422_s2 + $0x10] sm:$0xff]  ;;  %v2575_v48 = vld [vmem:[%s4424_s4 + $0x2] sm:$0x3] }
  0xba   : > { %1148 = vmatprep.mubr.f32.mxu1 %v3129_v37  ;;  %v478_v38 = vld [vmem:[%s4422_s2 + $0x30] sm:$0xff] }
  0xbb   : > { %v3683_v58 = vpop.permute.xlu1 %1564  ;;  %v2790_v61 = vpack.c.bf16 %v470_v44, %v468_v45  ;;  %v3689_v62 = vpop.permute.xlu0 %1562  ;;  %v2788_v63 = vpack.c.bf16 %v471_v46, %v469_v49  ;;  %v3811_v44 = vld [vmem:[%s4424_s4 + $0xc] sm:$0x3]  ;;  %v2617_v45 = vld [vmem:[%s4422_s2 + $0xf8] sm:$0xff] }
  0xbc   : > { %v3837_v59 = vrot.slane %v3811_v44, %v3547_v54 }
  0xbd   : > { %2608 = vmatmul.mubr.msk.f32.gmra.mrb[14].mxu1 %vm480_vm2, %v2600_v51  ;;  %2789 = vmatprep.subr.bf16.mxu0 %v2788_v63  ;;  %v786_v63 = vrot.slane %v2575_v48, %v3545_v53 }
  0xbe   : > { %1314 = vmatprep.mubr.f32.mxu1 %v3129_v37  ;;  %2791 = vmatpush1.bf16.msra.mxu0 %v2790_v61 }
  0xbf   : > { %v1573_v56 = vpop.permute.xlu1 %1572  ;;  %v1571_v4 = vpop.permute.xlu0 %1570 }
  0xc0   : > { %v1584_v3 = vsel %vm1578_vm4, %v1573_v56, %v3683_v58  ;;  %v1583_v34 = vsel %vm1578_vm4, %v1571_v4, %v3689_v62  ;;  %v1580_v33 = vsel %vm1578_vm4, %v3683_v58, %v1573_v56  ;;  %v1579_v35 = vsel %vm1578_vm4, %v3689_v62, %v1571_v4 }
  0xc1   : > { %v1603_v5 = vmul.f32 %v3694_v0, %v1584_v3  ;;  %2618 = vmatmul.mubr.msk.f32.vlgmr.msra.gmra.mrb[0].mxu1 %vm480_vm2, %v2610_v20  ;;  %v1601_v30 = vmul.f32 %v3694_v0, %v1583_v34  ;;  %2559 = vmatmul.mubr.msk.f32.vlgmr.msra.gmra.mrb[8].mxu0 %vm480_vm2, %v472_v1  ;;  %v1602_v46 = vmul.f32 %v1593_v31, %v1580_v33 }
  0xc2   : > { %1320 = vmatprep.mubr.f32.mxu1 %v3129_v37  ;;  %2827 = vmatpush1.bf16.msra.mxu1 %v2826_v26  ;;  %v1600_v47 = vmul.f32 %v1593_v31, %v1579_v35  ;;  %v2627_v26 = vld [vmem:[%s4422_s2 + $0x100] sm:$0xff] }
  0xc3   : > { %v3720_v22 = vpop.permute.xlu1 %1568  ;;  %2829 = vmatprep.subr.bf16.mxu1 %v2828_v2  ;;  %v3725_v8 = vpop.permute.xlu0 %1566  ;;  %v2832_v9 = vpack.c.bf16 %v1603_v5, %v1601_v30  ;;  %575 = vmatprep.mubr.f32.mxu0 %v3129_v37 }
  0xc4   : > { %v2834_v20 = vpack.c.bf16 %v1602_v46, %v1600_v47  ;;  %v2630_v46 = vld [vmem:[%s4422_s2 + $0x118] sm:$0xff] }
  0xc5   : > { %2619 = vmatmul.mubr.msk.f32.gmra.mrb[2].mxu1 %vm480_vm2, %v2611_v6  ;;  %2560 = vmatmul.mubr.msk.f32.gmra.mrb[10].mxu0 %vm480_vm2, %v473_v7 }
  0xc6   : > { %1326 = vmatprep.mubr.f32.mxu1 %v3129_v37  ;;  %2831 = vmatpush1.bf16.msra.mxu1 %v2830_v19 }
  0xc7   : > { %v1577_v11 = vpop.permute.xlu1 %1576  ;;  %v1575_v13 = vpop.permute.xlu0 %1574  ;;  %2833 = vmatprep.subr.bf16.mxu1 %v2832_v9  ;;  %581 = vmatprep.mubr.f32.mxu0 %v3129_v37  ;;  %v2628_v9 = vld [vmem:[%s4422_s2 + $0x108] sm:$0xff] }
  0xc8   : > { %v1586_v40 = vsel %vm1578_vm4, %v1577_v11, %v3720_v22  ;;  %v1585_v41 = vsel %vm1578_vm4, %v1575_v13, %v3725_v8  ;;  %v1582_v57 = vsel %vm1578_vm4, %v3720_v22, %v1577_v11  ;;  %v1581_v58 = vsel %vm1578_vm4, %v3725_v8, %v1575_v13 }
  0xc9   : > { %2620 = vmatmul.mubr.msk.f32.gmra.mrb[4].mxu1 %vm480_vm2, %v2612_v10  ;;  %2561 = vmatmul.mubr.msk.f32.gmra.mrb[12].mxu0 %vm480_vm2, %v474_v12  ;;  %v1607_v49 = vmul.f32 %v3694_v0, %v1586_v40  ;;  %v1605_v50 = vmul.f32 %v3694_v0, %v1585_v41  ;;  %v790_v0 = vrot.slane %v2575_v48, %v3547_v54 }
  0xca   : > { %1332 = vmatprep.mubr.f32.mxu1 %v3129_v37  ;;  %587 = vmatprep.mubr.f32.mxu0 %v3129_v37  ;;  %v1606_v39 = vmul.f32 %v1593_v31, %v1582_v57  ;;  %v1604_v43 = vmul.f32 %v1593_v31, %v1581_v58  ;;  %v1801_v57 = vrot.slane %v3811_v44, %v3545_v53 }
  0xcb   : > { %v3744_v15 = vpop.permute.xlu1 %1772  ;;  %v3750_v17 = vpop.permute.xlu0 %1770  ;;  %v2836_v56 = vpack.c.bf16 %v1607_v49, %v1605_v50  ;;  %v2632_v49 = vld [vmem:[%s4422_s2 + $0x128] sm:$0xff] }
  0xcc   : > { %v2838_v10 = vpack.c.bf16 %v1606_v39, %v1604_v43 }
  0xcd   : > { %2621 = vmatmul.mubr.msk.f32.gmra.mrb[6].mxu1 %vm480_vm2, %v2613_v14  ;;  %2562 = vmatmul.mubr.msk.f32.gmra.mrb[14].mxu0 %vm480_vm2, %v475_v16 }
  0xce   : > { %1338 = vmatprep.mubr.f32.mxu1 %v3129_v37  ;;  %593 = vmatprep.mubr.f32.mxu0 %v3129_v37 }
  0xcf   : > { %v3758_v21 = vpop.permute.xlu1 %1780  ;;  %v3764_v24 = vpop.permute.xlu0 %1778 }
  0xd0   : > { %v1792_v61 = vsel %vm1786_vm5, %v3758_v21, %v3744_v15  ;;  %v1791_v62 = vsel %vm1786_vm5, %v3764_v24, %v3750_v17  ;;  %v1788_v58 = vsel %vm1786_vm5, %v3744_v15, %v3758_v21 }
  0xd1   : > { %2622 = vmatmul.mubr.msk.f32.gmra.mrb[8].mxu1 %vm480_vm2, %v2614_v18  ;;  %2563 = vmatmul.mubr.msk.f32.gmra.mrb[16].mxu0 %vm480_vm2, %v476_v23  ;;  %v1811_v2 = vmul.f32 %v3837_v59, %v1792_v61  ;;  %v1809_v3 = vmul.f32 %v3837_v59, %v1791_v62  ;;  %v2629_v18 = vld [vmem:[%s4422_s2 + $0x110] sm:$0xff]  ;;  %v3946_v61 = vld [vmem:[%s4424_s4 + $0xe] sm:$0x3]  ;;  %v1810_v21 = vmul.f32 %v1801_v57, %v1788_v58 }
  0xd2   : > { %1344 = vmatprep.mubr.f32.mxu1 %v3129_v37  ;;  %599 = vmatprep.mubr.f32.mxu0 %v3129_v37  ;;  %v3964_v62 = vrot.slane %v3946_v61, %v3547_v54  ;;  %v4046_v58 = vld [vmem:[%s4424_s4 + $0x10] sm:$0x3] }
  0xd3   : > { %v3772_v27 = vpop.permute.xlu1 %1776  ;;  %v3778_v29 = vpop.permute.xlu0 %1774  ;;  %v2840_v12 = vpack.c.bf16 %v1811_v2, %v1809_v3 }
  0xd5   : > { %2623 = vmatmul.mubr.msk.f32.gmra.mrb[10].mxu1 %vm480_vm2, %v2615_v25  ;;  %2564 = vmatmul.mubr.msk.f32.gmra.mrb[18].mxu0 %vm480_vm2, %v477_v28 }
  0xd6   : > { %1350 = vmatprep.mubr.f32.mxu1 %v3129_v37  ;;  %605 = vmatprep.mubr.f32.mxu0 %v3129_v37 }
  0xd7   : > { %v3794_v36 = vpop.permute.xlu1 %1784  ;;  %v3806_v42 = vpop.permute.xlu0 %1782 }
  0xd8   : > { %v1794_v44 = vsel %vm1786_vm5, %v3794_v36, %v3772_v27  ;;  %v1793_v15 = vsel %vm1786_vm5, %v3806_v42, %v3778_v29 }
  0xd9   : > { %2624 = vmatmul.mubr.msk.f32.gmra.mrb[12].mxu1 %vm480_vm2, %v2616_v32  ;;  %2565 = vmatmul.mubr.msk.f32.gmra.mrb[20].mxu0 %vm480_vm2, %v478_v38 }
  0xda   : > { %1356 = vmatprep.mubr.f32.mxu1 %v3129_v37  ;;  %611 = vmatprep.mubr.f32.mxu0 %v3129_v37 }
  0xdb   : > { %v758_v51 = vpop.permute.xlu1 %757  ;;  %v756_v60 = vpop.permute.xlu0 %755 }
  0xdd   : > { %2625 = vmatmul.mubr.msk.f32.gmra.mrb[14].mxu1 %vm480_vm2, %v2617_v45  ;;  %2566 = vmatmul.mubr.msk.f32.gmra.mrb[22].mxu0 %vm480_vm2, %v479_v55  ;;  %v2631_v45 = vld [vmem:[%s4422_s2 + $0x120] sm:$0xff]  ;;  %v2633_v55 = vld [vmem:[%s4422_s2 + $0x130] sm:$0xff] }
  0xde   : > { %1497 = vmatprep.mubr.f32.mxu1 %v3129_v37  ;;  %706 = vmatprep.mubr.f32.mxu0 %v3129_v37 }
  0xdf   : > { %v766_v1 = vpop.permute.xlu1 %765  ;;  %v764_v34 = vpop.permute.xlu0 %763 }
  0xe0   : > { %v773_v4 = vsel %vm771_vm6, %v758_v51, %v766_v1  ;;  %v777_v5 = vsel %vm771_vm6, %v766_v1, %v758_v51  ;;  %v772_v19 = vsel %vm771_vm6, %v756_v60, %v764_v34  ;;  %v776_v22 = vsel %vm771_vm6, %v764_v34, %v756_v60 }
  0xe1   : > { %v3863_v30 = vmul.f32 %v786_v63, %v777_v5  ;;  %v3865_v6 = vmul.f32 %v790_v0, %v773_v4  ;;  %2635 = vmatmul.mubr.msk.f32.vlgmr.msra.gmra.mrb[0].mxu1 %vm480_vm2, %v2627_v26  ;;  %v3872_v7 = vmul.f32 %v786_v63, %v776_v22  ;;  %v3874_v8 = vmul.f32 %v790_v0, %v772_v19  ;;  %v2645_v4 = vld [vmem:[%s4422_s2 + $0x148] sm:$0xff]  ;;  %v2646_v19 = vld [vmem:[%s4422_s2 + $0x150] sm:$0xff]  ;;  %v2647_v22 = vld [vmem:[%s4422_s2 + $0x158] sm:$0xff] }
  0xe2   : > { %1503 = vmatprep.mubr.f32.mxu1 %v3129_v37  ;;  %2835 = vmatpush1.bf16.msra.mxu1 %v2834_v20  ;;  %v1787_v60 = vsel %vm1786_vm5, %v3750_v17, %v3764_v24  ;;  %v2634_v17 = vld [vmem:[%s4422_s2 + $0x138] sm:$0xff]  ;;  %v1789_v20 = vsel %vm1786_vm5, %v3778_v29, %v3806_v42  ;;  %v1813_v26 = vmul.f32 %v3837_v59, %v1793_v15 }
  0xe3   : > { %v762_v11 = vpop.permute.xlu1 %761  ;;  %2837 = vmatprep.subr.bf16.mxu1 %v2836_v56  ;;  %v2802_v13 = vpack.c.bf16 %v3863_v30, %v3872_v7  ;;  %v760_v14 = vpop.permute.xlu0 %759  ;;  %v2800_v16 = vpack.c.bf16 %v3865_v6, %v3874_v8  ;;  %v1808_v24 = vmul.f32 %v1801_v57, %v1787_v60  ;;  %v1812_v42 = vmul.f32 %v1801_v57, %v1789_v20  ;;  %v2668_v6 = vld [vmem:[%s4422_s2 + $0x1b8] sm:$0xff]  ;;  %v418_v8 = vld [vmem:[%s4423_s3 + $0x8] sm:$0xff]  ;;  %v2678_v30 = vld [vmem:[%s4422_s2 + $0x1c0] sm:$0xff] }
  0xe4   : > { %v419_v7 = vld [vmem:[%s4423_s3 + $0x10] sm:$0xff] }
  0xe5   : > { %2636 = vmatmul.mubr.msk.f32.gmra.mrb[2].mxu1 %vm480_vm2, %v2628_v9  ;;  %v2842_v29 = vpack.c.bf16 %v1810_v21, %v1808_v24  ;;  %v4066_v21 = vrot.slane %v4046_v58, %v3547_v54 }
  0xe6   : > { %1509 = vmatprep.mubr.f32.mxu1 %v3129_v37  ;;  %2839 = vmatpush1.bf16.msra.mxu1 %v2838_v10 }
  0xe7   : > { %v770_v23 = vpop.permute.xlu1 %769  ;;  %2841 = vmatprep.subr.bf16.mxu1 %v2840_v12  ;;  %v768_v31 = vpop.permute.xlu0 %767 }
  0xe8   : > { %v775_v25 = vsel %vm771_vm6, %v762_v11, %v770_v23  ;;  %v779_v28 = vsel %vm771_vm6, %v770_v23, %v762_v11  ;;  %v774_v35 = vsel %vm771_vm6, %v760_v14, %v768_v31  ;;  %v778_v38 = vsel %vm771_vm6, %v768_v31, %v760_v14  ;;  %v2648_v11 = vld [vmem:[%s4422_s2 + $0x160] sm:$0xff] }
  0xe9   : > { %v3893_v32 = vmul.f32 %v786_v63, %v779_v28  ;;  %v3895_v33 = vmul.f32 %v790_v0, %v775_v25  ;;  %2637 = vmatmul.mubr.msk.f32.gmra.mrb[4].mxu1 %vm480_vm2, %v2629_v18  ;;  %v3902_v40 = vmul.f32 %v786_v63, %v778_v38  ;;  %v3904_v41 = vmul.f32 %v790_v0, %v774_v35  ;;  %v2649_v18 = vld [vmem:[%s4422_s2 + $0x168] sm:$0xff]  ;;  %v2394_v23 = vld [vmem:[%s4425_s5] sm:$0xff]  ;;  %v2397_v38 = vld [vmem:[%s4425_s5 + $0x18] sm:$0xff] }
  0xea   : > { %1515 = vmatprep.mubr.f32.mxu1 %v3129_v37  ;;  %v1790_v63 = vsel %vm1786_vm5, %v3772_v27, %v3794_v36  ;;  %v1815_v0 = vmul.f32 %v3837_v59, %v1794_v44  ;;  %v2644_v27 = vld [vmem:[%s4422_s2 + $0x140] sm:$0xff]  ;;  %v3137_v25 = vmov 0   ;;  %v2395_v28 = vld [vmem:[%s4425_s5 + $0x8] sm:$0xff] }
  0xeb   : > { %v2806_v47 = vpack.c.bf16 %v3893_v32, %v3902_v40  ;;  %v2804_v48 = vpack.c.bf16 %v3895_v33, %v3904_v41  ;;  %v3925_v50 = vpop.permute.xlu1 %1980  ;;  %v3927_v51 = vpop.permute.xlu0 %1978  ;;  %v1814_v36 = vmul.f32 %v1801_v57, %v1790_v63  ;;  %3062 = vset.pattern.permute.xlu0 %v3137_v25  ;;  %3063 = vset.pattern.permute.xlu1 %v3137_v25  ;;  %v420_v32 = vld [vmem:[%s4423_s3 + $0x18] sm:$0xff] }
  0xec   : > { %v2844_v59 = vpack.c.bf16 %v1815_v0, %v1813_v26  ;;  %2404 = vperm.xlu0 %3062, %v2394_v23   ;;  %2409 = vperm.xlu1 %3063, %v2395_v28   ;;  %v2665_v23 = vld [vmem:[%s4422_s2 + $0x1a0] sm:$0xff] }
  0xed   : > { %2638 = vmatmul.mubr.msk.f32.gmra.mrb[6].mxu1 %vm480_vm2, %v2630_v46  ;;  %v2846_v5 = vpack.c.bf16 %v1814_v36, %v1812_v42  ;;  %v2396_v46 = vld [vmem:[%s4425_s5 + $0x10] sm:$0xff] }
  0xee   : > { %1521 = vmatprep.mubr.f32.mxu1 %v3129_v37 }
  0xef   : > { %v1989_v39 = vpop.permute.xlu1 %1988  ;;  %v1987_v43 = vpop.permute.xlu0 %1986 }
  0xf0   : > { %v2000_v56 = vsel %vm1994_vm7, %v1989_v39, %v3925_v50  ;;  %v1999_v1 = vsel %vm1994_vm7, %v1987_v43, %v3927_v51  ;;  %v1995_v57 = vsel %vm1994_vm7, %v3927_v51, %v1987_v43  ;;  %2419 = vperm.xlu0 %3062, %v2397_v38   ;;  %2414 = vperm.xlu1 %3063, %v2396_v46   ;;  %v2398_v51 = vld [vmem:[%s4425_s5 + $0x20] sm:$0xff] }
  0xf1   : > { %2639 = vmatmul.mubr.msk.f32.gmra.mrb[8].mxu1 %vm480_vm2, %v2631_v45  ;;  %v2019_v2 = vmul.f32 %v3964_v62, %v2000_v56  ;;  %v2017_v3 = vmul.f32 %v3964_v62, %v1999_v1  ;;  %v2650_v45 = vld [vmem:[%s4422_s2 + $0x170] sm:$0xff]  ;;  %v2661_v1 = vld [vmem:[%s4422_s2 + $0x180] sm:$0xff] }
  0xf2   : > { %1527 = vmatprep.mubr.f32.mxu1 %v3129_v37  ;;  %v2400_v56 = vld [vmem:[%s4425_s5 + $0x30] sm:$0xff] }
  0xf3   : > { %v2848_v34 = vpack.c.bf16 %v2019_v2, %v2017_v3  ;;  %v1985_v9 = vpop.permute.xlu1 %1984  ;;  %v1983_v10 = vpop.permute.xlu0 %1982  ;;  %v2662_v3 = vld [vmem:[%s4422_s2 + $0x188] sm:$0xff] }
  0xf4   : > { %2424 = vperm.xlu1 %3063, %v2398_v51   ;;  %v417_v51 = vld [vmem:[%s4423_s3] sm:$0xff] }
  0xf5   : > { %2640 = vmatmul.mubr.msk.f32.gmra.mrb[10].mxu1 %vm480_vm2, %v2632_v49  ;;  %v2009_v49 = vrot.slane %v3946_v61, %v3545_v53  ;;  %v2651_v61 = vld [vmem:[%s4422_s2 + $0x178] sm:$0xff] }
  0xf6   : > { %1533 = vmatprep.mubr.f32.mxu1 %v3129_v37 }
  0xf7   : > { %v1993_v12 = vpop.permute.xlu1 %1992  ;;  %v1991_v14 = vpop.permute.xlu0 %1990 }
  0xf8   : > { %v2002_v60 = vsel %vm1994_vm7, %v1993_v12, %v1985_v9  ;;  %v2001_v44 = vsel %vm1994_vm7, %v1991_v14, %v1983_v10  ;;  %v1998_v24 = vsel %vm1994_vm7, %v1985_v9, %v1993_v12  ;;  %v1997_v0 = vsel %vm1994_vm7, %v1983_v10, %v1991_v14  ;;  %2434 = vperm.xlu1 %3063, %v2400_v56   ;;  %v2664_v10 = vld [vmem:[%s4422_s2 + $0x198] sm:$0xff]  ;;  %v2684_v56 = vld [vmem:[%s4422_s2 + $0x1f0] sm:$0xff] }
  0xf9   : > { %2641 = vmatmul.mubr.msk.f32.gmra.mrb[12].mxu1 %vm480_vm2, %v2633_v55  ;;  %v1996_v55 = vsel %vm1994_vm7, %v3925_v50, %v1989_v39  ;;  %v2399_v50 = vld [vmem:[%s4425_s5 + $0x28] sm:$0xff]  ;;  %v2023_v63 = vmul.f32 %v3964_v62, %v2002_v60  ;;  %v2021_v20 = vmul.f32 %v3964_v62, %v2001_v44  ;;  %v2401_v62 = vld [vmem:[%s4425_s5 + $0x38] sm:$0xff]  ;;  %v2020_v36 = vmul.f32 %v2009_v49, %v1997_v0  ;;  %v2667_v60 = vld [vmem:[%s4422_s2 + $0x1b0] sm:$0xff] }
  0xfa   : > { %1539 = vmatprep.mubr.f32.mxu1 %v3129_v37  ;;  %v2018_v15 = vmul.f32 %v2009_v49, %v1996_v55  ;;  %2429 = vperm.xlu0 %3062, %v2399_v50  }
  0xfb   : > { %v4021_v31 = vpop.permute.xlu1 %2188  ;;  %v4023_v35 = vpop.permute.xlu0 %2186  ;;  %v2852_v42 = vpack.c.bf16 %v2023_v63, %v2021_v20  ;;  %v2681_v20 = vld [vmem:[%s4422_s2 + $0x1d8] sm:$0xff] }
  0xfd   : > { %2642 = vmatmul.mubr.msk.f32.gmra.mrb[14].mxu1 %vm480_vm2, %v2634_v17  ;;  %v2016_v17 = vmul.f32 %v2009_v49, %v1995_v57 }
  0xfe   : > { %1705 = vmatprep.mubr.f32.mxu1 %v3129_v37  ;;  %2439 = vperm.xlu0 %3062, %v2401_v62   ;;  %v424_v62 = vld [vmem:[%s4423_s3 + $0x38] sm:$0xff] }
  0xff   : > { %v4074_v26 = vpop.permute.xlu1 %2196  ;;  %v4076_v39 = vpop.permute.xlu0 %2194 }
 0x100   : > { %v2208_v54 = vsel %vm2202_vm8, %v4074_v26, %v4021_v31  ;;  %v2207_v43 = vsel %vm2202_vm8, %v4076_v39, %v4023_v35 }
 0x101   : > { %2652 = vmatmul.mubr.msk.f32.vlgmr.msra.gmra.mrb[0].mxu1 %vm480_vm2, %v2644_v27  ;;  %v2850_v27 = vpack.c.bf16 %v2018_v15, %v2016_v17  ;;  %v2225_v2 = vmul.f32 %v4066_v21, %v2207_v43  ;;  %v2204_v15 = vsel %vm2202_vm8, %v4021_v31, %v4074_v26  ;;  %v2203_v17 = vsel %vm2202_vm8, %v4023_v35, %v4076_v39  ;;  %v422_v26 = vld [vmem:[%s4423_s3 + $0x28] sm:$0xff]  ;;  %v2682_v39 = vld [vmem:[%s4422_s2 + $0x1e0] sm:$0xff] }
 0x102   : > { %1711 = vmatprep.mubr.f32.mxu1 %v3129_v37  ;;  %2843 = vmatpush1.bf16.msra.mxu1 %v2842_v29  ;;  %v2022_v29 = vmul.f32 %v2009_v49, %v1998_v24  ;;  %v2683_v43 = vld [vmem:[%s4422_s2 + $0x1e8] sm:$0xff] }
 0x103   : > { %2845 = vmatprep.subr.bf16.mxu1 %v2844_v59  ;;  %v2227_v59 = vmul.f32 %v4066_v21, %v2208_v54  ;;  %v2193_v28 = vpop.permute.xlu1 %2192  ;;  %v2191_v38 = vpop.permute.xlu0 %2190  ;;  %v423_v54 = vld [vmem:[%s4423_s3 + $0x30] sm:$0xff] }
 0x105   : > { %2653 = vmatmul.mubr.msk.f32.gmra.mrb[2].mxu1 %vm480_vm2, %v2645_v4  ;;  %v2854_v4 = vpack.c.bf16 %v2022_v29, %v2020_v36  ;;  %v2577_v29 = vld [vmem:[%s4422_s2 + $0x48] sm:$0xff]  ;;  %v2578_v36 = vld [vmem:[%s4422_s2 + $0x50] sm:$0xff] }
 0x106   : > { %1717 = vmatprep.mubr.f32.mxu1 %v3129_v37  ;;  %2847 = vmatpush1.bf16.msra.mxu1 %v2846_v5  ;;  %v4104_v5 = vpack.c.bf16 %v2227_v59, %v2225_v2  ;;  %v2579_v59 = vld [vmem:[%s4422_s2 + $0x58] sm:$0xff]  ;;  %v2580_v2 = vld [vmem:[%s4422_s2 + $0x60] sm:$0xff] }
 0x107   : > { %2849 = vmatprep.subr.bf16.mxu1 %v2848_v34  ;;  %v2201_v44 = vpop.permute.xlu1 %2200 }
 0x108   : > { %v2199_v50 = vpop.permute.xlu0 %2198  ;;  %v2210_v24 = vsel %vm2202_vm8, %v2201_v44, %v2193_v28  ;;  %v2206_v35 = vsel %vm2202_vm8, %v2193_v28, %v2201_v44 }
 0x109   : > { %2654 = vmatmul.mubr.msk.f32.gmra.mrb[4].mxu1 %vm480_vm2, %v2646_v19  ;;  %v2663_v19 = vld [vmem:[%s4422_s2 + $0x190] sm:$0xff]  ;;  %v2205_v63 = vsel %vm2202_vm8, %v2191_v38, %v2199_v50 }
 0x10a   : > { %1723 = vmatprep.mubr.f32.mxu1 %v3129_v37 }
 0x10d   : > { %2655 = vmatmul.mubr.msk.f32.gmra.mrb[6].mxu1 %vm480_vm2, %v2647_v22 }
 0x10e   : > { %1729 = vmatprep.mubr.f32.mxu1 %v3129_v37 }
 0x111   : > { %2656 = vmatmul.mubr.msk.f32.gmra.mrb[8].mxu1 %vm480_vm2, %v2648_v11 }
 0x112   : > { %1735 = vmatprep.mubr.f32.mxu1 %v3129_v37 }
 0x115   : > { %2657 = vmatmul.mubr.msk.f32.gmra.mrb[10].mxu1 %vm480_vm2, %v2649_v18 }
 0x116   : > { %1741 = vmatprep.mubr.f32.mxu1 %v3129_v37 }
 0x119   : > { %2658 = vmatmul.mubr.msk.f32.gmra.mrb[12].mxu1 %vm480_vm2, %v2650_v45  ;;  %v2666_v45 = vld [vmem:[%s4422_s2 + $0x1a8] sm:$0xff] }
 0x11a   : > { %1747 = vmatprep.mubr.f32.mxu1 %v3129_v37 }
 0x11d   : > { %2659 = vmatmul.mubr.msk.f32.gmra.mrb[14].mxu1 %vm480_vm2, %v2651_v61  ;;  %v2217_v61 = vrot.slane %v4046_v58, %v3545_v53  ;;  %v2209_v53 = vsel %vm2202_vm8, %v2199_v50, %v2191_v38  ;;  %v2231_v58 = vmul.f32 %v4066_v21, %v2210_v24 }
 0x11e   : > { %1913 = vmatprep.mubr.f32.mxu1 %v3129_v37  ;;  %v2229_v0 = vmul.f32 %v4066_v21, %v2209_v53  ;;  %v421_v21 = vld [vmem:[%s4423_s3 + $0x20] sm:$0xff] }
 0x11f   : > { %v2224_v31 = vmul.f32 %v2217_v61, %v2203_v17  ;;  %v2228_v33 = vmul.f32 %v2217_v61, %v2205_v63 }
 0x120   : > { %v2860_v41 = vpack.c.bf16 %v2231_v58, %v2229_v0 }
 0x121   : > { %2669 = vmatmul.mubr.msk.f32.vlgmr.msra.gmra.mrb[0].mxu1 %vm480_vm2, %v2661_v1  ;;  %v2576_v1 = vld [vmem:[%s4422_s2 + $0x40] sm:$0xff] }
 0x122   : > { %1919 = vmatprep.mubr.f32.mxu1 %v3129_v37  ;;  %2851 = vmatpush1.bf16.msra.mxu1 %v2850_v27  ;;  %v2685_v27 = vld [vmem:[%s4422_s2 + $0x1f8] sm:$0xff] }
 0x123   : > { %2853 = vmatprep.subr.bf16.mxu1 %v2852_v42  ;;  %v2702_v42 = vld [vmem:[%s4422_s2 + $0x238] sm:$0xff] }
 0x125   : > { %2670 = vmatmul.mubr.msk.f32.gmra.mrb[2].mxu1 %vm480_vm2, %v2662_v3  ;;  %v394_v34 = vpop.f32.mrb[0].mxu0  ;;  %v2581_v3 = vld [vmem:[%s4422_s2 + $0x68] sm:$0xff] }
 0x126   : > { %1925 = vmatprep.mubr.f32.mxu1 %v3129_v37  ;;  %2855 = vmatpush1.bf16.msra.mxu1 %v2854_v4  ;;  %v396_v22 = vpop.f32.mrb[1].mxu0  ;;  %v2582_v4 = vld [vmem:[%s4422_s2 + $0x70] sm:$0xff] }
 0x127   : > { %2864 = vmatprep.subr.bf16.mxu1 %v4104_v5 }
 0x129   : > { %2671 = vmatmul.mubr.msk.f32.gmra.mrb[4].mxu1 %vm480_vm2, %v2663_v19  ;;  %v400_v9 = vpop.f32.mrb[2].mxu0  ;;  %v2696_v19 = vld [vmem:[%s4422_s2 + $0x208] sm:$0xff] }
 0x12a   : > { %1931 = vmatprep.mubr.f32.mxu1 %v3129_v37  ;;  %v2794_v11 = vpack.c.bf16 %v400_v9, %v394_v34  ;;  %v402_v12 = vpop.f32.mrb[3].mxu0  ;;  %v2695_v34 = vld [vmem:[%s4422_s2 + $0x200] sm:$0xff]  ;;  %v2698_v9 = vld [vmem:[%s4422_s2 + $0x218] sm:$0xff] }
 0x12b   : > { %v2792_v14 = vpack.c.bf16 %v402_v12, %v396_v22  ;;  %v2697_v22 = vld [vmem:[%s4422_s2 + $0x210] sm:$0xff] }
 0x12c   : > { %v2701_v12 = vld [vmem:[%s4422_s2 + $0x230] sm:$0xff] }
 0x12d   : > { %2672 = vmatmul.mubr.msk.f32.gmra.mrb[6].mxu1 %vm480_vm2, %v2664_v10  ;;  %2793 = vmatprep.subr.bf16.mxu0 %v2792_v14  ;;  %v406_v18 = vpop.f32.mrb[4].mxu0  ;;  %v2699_v10 = vld [vmem:[%s4422_s2 + $0x220] sm:$0xff] }
 0x12e   : > { %1937 = vmatprep.mubr.f32.mxu1 %v3129_v37  ;;  %2795 = vmatpush1.bf16.msra.mxu0 %v2794_v11  ;;  %v408_v25 = vpop.f32.mrb[5].mxu0  ;;  %v2700_v11 = vld [vmem:[%s4422_s2 + $0x228] sm:$0xff] }
 0x131   : > { %2673 = vmatmul.mubr.msk.f32.gmra.mrb[8].mxu1 %vm480_vm2, %v2665_v23  ;;  %v412_v46 = vpop.f32.mrb[6].mxu0 }
 0x132   : > { %1943 = vmatprep.mubr.f32.mxu1 %v3129_v37  ;;  %v2798_v49 = vpack.c.bf16 %v412_v46, %v406_v18  ;;  %v414_v55 = vpop.f32.mrb[7].mxu0 }
 0x133   : > { %v2796_v57 = vpack.c.bf16 %v414_v55, %v408_v25 }
 0x135   : > { %2674 = vmatmul.mubr.msk.f32.gmra.mrb[10].mxu1 %vm480_vm2, %v2666_v45  ;;  %2797 = vmatprep.subr.bf16.mxu0 %v2796_v57 }
 0x136   : > { %1949 = vmatprep.mubr.f32.mxu1 %v3129_v37  ;;  %2799 = vmatpush1.bf16.msra.mxu0 %v2798_v49 }
 0x137   : > { %2801 = vmatprep.subr.bf16.mxu0 %v2800_v16  ;;  %v2226_v16 = vmul.f32 %v2217_v61, %v2204_v15 }
 0x139   : > { %2675 = vmatmul.mubr.msk.f32.gmra.mrb[12].mxu1 %vm480_vm2, %v2667_v60  ;;  %2567 = vmatmul.mubr.msk.f32.vlgmr.msra.gmra.mrb[8].mxu0 %vm480_vm2, %v417_v51  ;;  %v2858_v52 = vpack.c.bf16 %v2226_v16, %v2224_v31 }
 0x13a   : > { %1955 = vmatprep.mubr.f32.mxu1 %v3129_v37  ;;  %712 = vmatprep.mubr.f32.mxu0 %v3129_v37 }
 0x13b   : > { %2803 = vmatpush1.bf16.msra.mxu0 %v2802_v13  ;;  %v2230_v13 = vmul.f32 %v2217_v61, %v2206_v35 }
 0x13c   : > { %2805 = vmatprep.subr.bf16.mxu0 %v2804_v48  ;;  %v2679_v48 = vld [vmem:[%s4422_s2 + $0x1c8] sm:$0xff] }
 0x13d   : > { %2676 = vmatmul.mubr.msk.f32.gmra.mrb[14].mxu1 %vm480_vm2, %v2668_v6  ;;  %2568 = vmatmul.mubr.msk.f32.gmra.mrb[10].mxu0 %vm480_vm2, %v418_v8  ;;  %v2862_v40 = vpack.c.bf16 %v2230_v13, %v2228_v33 }
 0x13e   : > { %2121 = vmatprep.mubr.f32.mxu1 %v3129_v37  ;;  %718 = vmatprep.mubr.f32.mxu0 %v3129_v37 }
 0x13f   : > { %2807 = vmatpush1.bf16.msra.mxu0 %v2806_v47  ;;  %v2680_v47 = vld [vmem:[%s4422_s2 + $0x1d0] sm:$0xff] }
 0x140   : > { %2857 = vmatprep.subr.bf16.mxu0 %v4104_v5  ;;  %v2583_v5 = vld [vmem:[%s4422_s2 + $0x78] sm:$0xff] }
 0x141   : > { %2686 = vmatmul.mubr.msk.f32.vlgmr.msra.gmra.mrb[0].mxu1 %vm480_vm2, %v2678_v30  ;;  %2569 = vmatmul.mubr.msk.f32.gmra.mrb[12].mxu0 %vm480_vm2, %v419_v7 }
 0x142   : > { %2127 = vmatprep.mubr.f32.mxu1 %v3129_v37  ;;  %724 = vmatprep.mubr.f32.mxu0 %v3129_v37 }
 0x143   : > { %2866 = vmatpush1.bf16.msra.mxu1 %v2858_v52 }
 0x144   : > { %2865 = vmatprep.subr.bf16.mxu1 %v2860_v41 }
 0x145   : > { %2687 = vmatmul.mubr.msk.f32.gmra.mrb[2].mxu1 %vm480_vm2, %v2679_v48  ;;  %2570 = vmatmul.mubr.msk.f32.gmra.mrb[14].mxu0 %vm480_vm2, %v420_v32 }
 0x146   : > { %2133 = vmatprep.mubr.f32.mxu1 %v3129_v37  ;;  %730 = vmatprep.mubr.f32.mxu0 %v3129_v37 }
 0x147   : > { %2867 = vmatpush1.bf16.msra.mxu1 %v2862_v40 }
 0x149   : > { %2688 = vmatmul.mubr.msk.f32.gmra.mrb[4].mxu1 %vm480_vm2, %v2680_v47  ;;  %2571 = vmatmul.mubr.msk.f32.gmra.mrb[16].mxu0 %vm480_vm2, %v421_v21 }
 0x14a   : > { %2139 = vmatprep.mubr.f32.mxu1 %v3129_v37  ;;  %736 = vmatprep.mubr.f32.mxu0 %v3129_v37 }
 0x14d   : > { %2689 = vmatmul.mubr.msk.f32.gmra.mrb[6].mxu1 %vm480_vm2, %v2681_v20  ;;  %2572 = vmatmul.mubr.msk.f32.gmra.mrb[18].mxu0 %vm480_vm2, %v422_v26 }
 0x14e   : > { %2145 = vmatprep.mubr.f32.mxu1 %v3129_v37  ;;  %742 = vmatprep.mubr.f32.mxu0 %v3129_v37 }
 0x151   : > { %2690 = vmatmul.mubr.msk.f32.gmra.mrb[8].mxu1 %vm480_vm2, %v2682_v39  ;;  %2573 = vmatmul.mubr.msk.f32.gmra.mrb[20].mxu0 %vm480_vm2, %v423_v54 }
 0x152   : > { %2151 = vmatprep.mubr.f32.mxu1 %v3129_v37  ;;  %748 = vmatprep.mubr.f32.mxu0 %v3129_v37 }
 0x155   : > { %2691 = vmatmul.mubr.msk.f32.gmra.mrb[10].mxu1 %vm480_vm2, %v2683_v43  ;;  %2574 = vmatmul.mubr.msk.f32.gmra.mrb[22].mxu0 %vm480_vm2, %v424_v62 }
 0x156   : > { %2157 = vmatprep.mubr.f32.mxu1 %v3129_v37  ;;  %898 = vmatprep.mubr.f32.mxu0 %v3129_v37 }
 0x159   : > { %2692 = vmatmul.mubr.msk.f32.gmra.mrb[12].mxu1 %vm480_vm2, %v2684_v56  ;;  %2584 = vmatmul.mubr.msk.f32.vlgmr.msra.gmra.mrb[8].mxu0 %vm480_vm2, %v2576_v1 }
 0x15a   : > { %2163 = vmatprep.mubr.f32.mxu1 %v3129_v37  ;;  %904 = vmatprep.mubr.f32.mxu0 %v3129_v37 }
 0x15b   : > { %2859 = vmatpush1.bf16.msra.mxu0 %v2858_v52 }
 0x15c   : > { %2861 = vmatprep.subr.bf16.mxu0 %v2860_v41 }
 0x15d   : > { %2693 = vmatmul.mubr.msk.f32.gmra.mrb[14].mxu1 %vm480_vm2, %v2685_v27  ;;  %2585 = vmatmul.mubr.msk.f32.gmra.mrb[10].mxu0 %vm480_vm2, %v2577_v29 }
 0x15e   : > { %2371 = vmatprep.mubr.f32.mxu1 %v3129_v37  ;;  %910 = vmatprep.mubr.f32.mxu0 %v3129_v37 }
 0x15f   : > { %2863 = vmatpush1.bf16.msra.mxu0 %v2862_v40 }
 0x161   : > { %2586 = vmatmul.mubr.msk.f32.gmra.mrb[12].mxu0 %vm480_vm2, %v2578_v36 }
 0x162   : > { %916 = vmatprep.mubr.f32.mxu0 %v3129_v37 }
 0x165   : > { %2710 = vmatmul.mubr.msk.f32.vlgmr.msra.gmra.mrb[14].mxu1 %vm480_vm2, %v2702_v42  ;;  %2587 = vmatmul.mubr.msk.f32.gmra.mrb[14].mxu0 %vm480_vm2, %v2579_v59 }
 0x166   : > { %922 = vmatprep.mubr.f32.mxu0 %v3129_v37 }
 0x169   : > { %2588 = vmatmul.mubr.msk.f32.gmra.mrb[16].mxu0 %vm480_vm2, %v2580_v2 }
 0x16a   : > { %928 = vmatprep.mubr.f32.mxu0 %v3129_v37 }
 0x16b   : > { %v2405_v58 = vpop.permute.xlu0 %2404 }
 0x16d   : > { %2589 = vmatmul.mubr.msk.f32.gmra.mrb[18].mxu0 %vm480_vm2, %v2581_v3 }
 0x16e   : > { %934 = vmatprep.mubr.f32.mxu0 %v3129_v37 }
 0x16f   : > { %v2420_v41 = vpop.permute.xlu0 %2419 }
 0x171   : > { %2590 = vmatmul.mubr.msk.f32.gmra.mrb[20].mxu0 %vm480_vm2, %v2582_v4 }
 0x172   : > { %940 = vmatprep.mubr.f32.mxu0 %v3129_v37 }
 0x175   : > { %2591 = vmatmul.mubr.msk.f32.gmra.mrb[22].mxu0 %vm480_vm2, %v2583_v5 }
 0x176   : > { %2329 = vmatprep.mubr.f32.mxu0 %v3129_v37 }
 0x179   : > { %2703 = vmatmul.mubr.msk.f32.vlgmr.msra.gmra.mrb[24].mxu0 %vm480_vm2, %v2695_v34  ;;  %v4334_v39 = vpop.permute.xlu0 %2429 }
 0x17a   : > { %2335 = vmatprep.mubr.f32.mxu0 %v3129_v37 }
 0x17d   : > { %2704 = vmatmul.mubr.msk.f32.gmra.mrb[26].mxu0 %vm480_vm2, %v2696_v19  ;;  %v2440_v27 = vpop.permute.xlu0 %2439 }
 0x17e   : > { %2341 = vmatprep.mubr.f32.mxu0 %v3129_v37 }
 0x181   : > { %2705 = vmatmul.mubr.msk.f32.gmra.mrb[28].mxu0 %vm480_vm2, %v2697_v22 }
 0x182   : > { %2347 = vmatprep.mubr.f32.mxu0 %v3129_v37 }
 0x185   : > { %2706 = vmatmul.mubr.msk.f32.gmra.mrb[30].mxu0 %vm480_vm2, %v2698_v9 }
 0x186   : > { %2353 = vmatprep.mubr.f32.mxu0 %v3129_v37 }
 0x189   : > { %2707 = vmatmul.mubr.msk.f32.gmra.mrb[32].mxu0 %vm480_vm2, %v2699_v10  ;;  %v2410_v10 = vpop.permute.xlu1 %2409 }
 0x18a   : > { %2359 = vmatprep.mubr.f32.mxu0 %v3129_v37 }
 0x18d   : > { %2708 = vmatmul.mubr.msk.f32.gmra.mrb[34].mxu0 %vm480_vm2, %v2700_v11 }
 0x18e   : > { %2365 = vmatprep.mubr.f32.mxu0 %v3129_v37 }
 0x191   : > { %2709 = vmatmul.mubr.msk.f32.gmra.mrb[36].mxu0 %vm480_vm2, %v2701_v12 }
 0x214   : > { %v2123_v14 = vpop.f32.mrb[0].mxu1 }
 0x215   : > { %v2125_v18 = vpop.f32.mrb[1].mxu1 }
 0x218   : > { %v2129_v23 = vpop.f32.mrb[2].mxu1 }
 0x219   : > { %v2131_v25 = vpop.f32.mrb[3].mxu1 }
 0x21c   : > { %v2135_v28 = vpop.f32.mrb[4].mxu1 }
 0x21d   : > { %v2137_v38 = vpop.f32.mrb[5].mxu1 }
 0x220   : > { %v2141_v46 = vpop.f32.mrb[6].mxu1 }
 0x221   : > { %v2143_v45 = vpop.f32.mrb[7].mxu1 }
 0x224   : > { %v2147_v49 = vpop.f32.mrb[8].mxu1 }
 0x225   : > { %v2149_v55 = vpop.f32.mrb[9].mxu1 }
 0x228   : > { %v2153_v57 = vpop.f32.mrb[10].mxu1 }
 0x229   : > { %v2155_v60 = vpop.f32.mrb[11].mxu1 }
 0x22c   : > { %v2159_v44 = vpop.f32.mrb[12].mxu1  ;;  %v900_v50 = vpop.f32.mrb[8].mxu0 }
 0x22d   : > { %v2161_v37 = vpop.f32.mrb[13].mxu1  ;;  %v2868_v51 = vadd.f32 %v2123_v14, %v900_v50  ;;  %v902_v61 = vpop.f32.mrb[9].mxu0 }
 0x22e   : > { %v2870_v15 = vadd.f32 %v2125_v18, %v902_v61 }
 0x230   : > { %v906_v17 = vpop.f32.mrb[10].mxu0 }
 0x231   : > { %v2872_v24 = vadd.f32 %v2129_v23, %v906_v17  ;;  %v908_v53 = vpop.f32.mrb[11].mxu0 }
 0x232   : > { %v2874_v6 = vadd.f32 %v2131_v25, %v908_v53 }
 0x234   : > { %v912_v8 = vpop.f32.mrb[12].mxu0 }
 0x235   : > { %v2876_v16 = vadd.f32 %v2135_v28, %v912_v8  ;;  %v914_v31 = vpop.f32.mrb[13].mxu0 }
 0x236   : > { %v2878_v35 = vadd.f32 %v2137_v38, %v914_v31 }
 0x238   : > { %v2373_v63 = vpop.f32.mrb[14].mxu1  ;;  %v918_v30 = vpop.f32.mrb[14].mxu0 }
 0x239   : > { %v2375_v0 = vpop.f32.mrb[15].mxu1  ;;  %v2880_v7 = vadd.f32 %v2141_v46, %v918_v30  ;;  %v920_v52 = vpop.f32.mrb[15].mxu0 }
 0x23a   : > { %v2882_v13 = vadd.f32 %v2143_v45, %v920_v52  ;;  %v2415_v45 = vpop.permute.xlu1 %2414 }
 0x23c   : > { %v924_v33 = vpop.f32.mrb[16].mxu0 }
 0x23d   : > { %v2884_v48 = vadd.f32 %v2147_v49, %v924_v33  ;;  %v926_v32 = vpop.f32.mrb[17].mxu0 }
 0x23e   : > { %v2886_v40 = vadd.f32 %v2149_v55, %v926_v32  ;;  %v2425_v53 = vpop.permute.xlu1 %2424 }
 0x240   : > { %v930_v47 = vpop.f32.mrb[18].mxu0 }
 0x241   : > { %v4330_v21 = vadd.f32 %v2153_v57, %v930_v47  ;;  %v932_v20 = vpop.f32.mrb[19].mxu0 }
 0x242   : > { %v4332_v26 = vadd.f32 %v2155_v60, %v932_v20  ;;  %v2435_v33 = vpop.permute.xlu1 %2434 }
 0x244   : > { %v936_v54 = vpop.f32.mrb[20].mxu0 }
 0x245   : > { %v4337_v43 = vadd.f32 %v2159_v44, %v936_v54  ;;  %v938_v62 = vpop.f32.mrb[21].mxu0 }
 0x246   : > { %v4339_v56 = vadd.f32 %v2161_v37, %v938_v62 }
 0x248   : > { %v942_v1 = vpop.f32.mrb[22].mxu0 }
 0x249   : > { %v2896_v29 = vadd.f32 %v2373_v63, %v942_v1  ;;  %v944_v36 = vpop.f32.mrb[23].mxu0 }
 0x24a   : > { %v2897_v42 = vadd.f32 %v2375_v0, %v944_v36 }
 0x24b   : > { %v2456_v59 = vadd.f32 %v2896_v29, %v2440_v27 }
 0x24c   : > { %v2457_v2 = vadd.f32 %v2897_v42, %v2440_v27  ;;  %v2331_v3 = vpop.f32.mrb[24].mxu0 }
 0x24d   : > { %2472 = vst [vmem:[%s4343_s26 + $0x70] sm:$0xff] %v2456_v59  ;;  %v2869_v4 = vadd.f32 %v2868_v51, %v2331_v3  ;;  %v2333_v5 = vpop.f32.mrb[25].mxu0 }
 0x24e   : > { %2473 = vst [vmem:[%s4343_s26 + $0x78] sm:$0xff] %v2457_v2  ;;  %v2871_v34 = vadd.f32 %v2870_v15, %v2333_v5 }
 0x24f   : > { %v2442_v19 = vadd.f32 %v2869_v4, %v2405_v58 }
 0x250   : > { %v2443_v22 = vadd.f32 %v2871_v34, %v2405_v58  ;;  %v2337_v9 = vpop.f32.mrb[26].mxu0 }
 0x251   : > { %2458 = vst [vmem:[%s4343_s26] sm:$0xff] %v2442_v19  ;;  %v2873_v11 = vadd.f32 %v2872_v24, %v2337_v9  ;;  %v2339_v12 = vpop.f32.mrb[27].mxu0 }
 0x252   : > { %2459 = vst [vmem:[%s4343_s26 + $0x8] sm:$0xff] %v2443_v22  ;;  %v2875_v14 = vadd.f32 %v2874_v6, %v2339_v12 }
 0x253   : > { %v2444_v18 = vadd.f32 %v2873_v11, %v2410_v10 }
 0x254   : > { %v2445_v23 = vadd.f32 %v2875_v14, %v2410_v10  ;;  %v2343_v25 = vpop.f32.mrb[28].mxu0 }
 0x255   : > { %2460 = vst [vmem:[%s4343_s26 + $0x10] sm:$0xff] %v2444_v18  ;;  %v2877_v28 = vadd.f32 %v2876_v16, %v2343_v25  ;;  %v2345_v38 = vpop.f32.mrb[29].mxu0 }
 0x256   : > { %2461 = vst [vmem:[%s4343_s26 + $0x18] sm:$0xff] %v2445_v23  ;;  %v2879_v46 = vadd.f32 %v2878_v35, %v2345_v38 }
 0x257   : > { %v2446_v49 = vadd.f32 %v2877_v28, %v2415_v45 }
 0x258   : > { %v2447_v55 = vadd.f32 %v2879_v46, %v2415_v45  ;;  %v2349_v57 = vpop.f32.mrb[30].mxu0 }
 0x259   : > { %2462 = vst [vmem:[%s4343_s26 + $0x20] sm:$0xff] %v2446_v49  ;;  %v2881_v60 = vadd.f32 %v2880_v7, %v2349_v57  ;;  %v2351_v44 = vpop.f32.mrb[31].mxu0 }
 0x25a   : > { %2463 = vst [vmem:[%s4343_s26 + $0x28] sm:$0xff] %v2447_v55  ;;  %v2883_v37 = vadd.f32 %v2882_v13, %v2351_v44 }
 0x25b   : > { %v2448_v50 = vadd.f32 %v2881_v60, %v2420_v41 }
 0x25c   : > { %v2449_v51 = vadd.f32 %v2883_v37, %v2420_v41  ;;  %v2355_v61 = vpop.f32.mrb[32].mxu0 }
 0x25d   : > { %2464 = vst [vmem:[%s4343_s26 + $0x30] sm:$0xff] %v2448_v50  ;;  %v2885_v15 = vadd.f32 %v2884_v48, %v2355_v61  ;;  %v2357_v17 = vpop.f32.mrb[33].mxu0 }
 0x25e   : > { %2465 = vst [vmem:[%s4343_s26 + $0x38] sm:$0xff] %v2449_v51  ;;  %v2887_v24 = vadd.f32 %v2886_v40, %v2357_v17 }
 0x25f   : > { %v2450_v6 = vadd.f32 %v2885_v15, %v2425_v53 }
 0x260   : > { %v2451_v8 = vadd.f32 %v2887_v24, %v2425_v53  ;;  %v2361_v16 = vpop.f32.mrb[34].mxu0 }
 0x261   : > { %2466 = vst [vmem:[%s4343_s26 + $0x40] sm:$0xff] %v2450_v6  ;;  %v2889_v31 = vadd.f32 %v4330_v21, %v2361_v16  ;;  %v2363_v35 = vpop.f32.mrb[35].mxu0 }
 0x262   : > { %2467 = vst [vmem:[%s4343_s26 + $0x48] sm:$0xff] %v2451_v8  ;;  %v2891_v58 = vadd.f32 %v4332_v26, %v2363_v35 }
 0x263   : > { %v2452_v63 = vadd.f32 %v2889_v31, %v4334_v39 }
 0x264   : > { %v2453_v0 = vadd.f32 %v2891_v58, %v4334_v39  ;;  %v2367_v30 = vpop.f32.mrb[36].mxu0 }
 0x265   : > { %2468 = vst [vmem:[%s4343_s26 + $0x50] sm:$0xff] %v2452_v63  ;;  %v2893_v7 = vadd.f32 %v4337_v43, %v2367_v30  ;;  %v2369_v52 = vpop.f32.mrb[37].mxu0 }
 0x266   : > { %2469 = vst [vmem:[%s4343_s26 + $0x58] sm:$0xff] %v2453_v0  ;;  %v2895_v13 = vadd.f32 %v4339_v56, %v2369_v52 }
 0x267   : > { %v2454_v41 = vadd.f32 %v2893_v7, %v2435_v33 }
 0x268   : > { %v2455_v48 = vadd.f32 %v2895_v13, %v2435_v33 }
 0x269   : > { %2470 = vst [vmem:[%s4343_s26 + $0x60] sm:$0xff] %v2454_v41 }
 0x26a   : > { %2471 = vst [vmem:[%s4343_s26 + $0x68] sm:$0xff] %v2455_v48 }
 0x26b   : > { %3077 = shalt.err (!%p3074_p3)
}
 0x26c   : > { %s3078_s16 = scalar_lea.hbm %s4370_s15, 2048  ;;  %s3082_s20 = scalar_lea.hbm %s4426_s6, 4096 }
 0x26d   : > { %p3079_p4 = scmp.ne.s32.totalorder %s4370_s15, %s3078_s16  ;;  %p3083_p9 = scmp.lt.u32.totalorder %s4370_s15, %s4426_s6 }
 0x26e   : > { %p3084_p10 = scmp.lt.u32.totalorder %s3082_s20, %s3078_s16  ;;  %p3086_p12 = scmp.lt.u32.totalorder %s3078_s16, %s4370_s15 }
 0x26f   : > { %p3080_p7 = pnand %p3079_p4, %p3213_p5 }
 0x270   : > { %p3085_p11 = por %p3084_p10, %p3083_p9 }
 0x271   : > { %p3081_p8 = pneg %p3080_p7 }
 0x272   : > { %p3087_p13 = por %p3086_p12, %p3085_p11 }
 0x274   : > { %p3088_p0 = pnand %p3087_p13, %p3081_p8 }
 0x276   : > { %3091 = shalt.err (!%p3088_p0)
}
 0x277   : > { %s3139_s29 = smov 256  }
 0x278   : > { %3012 = dma.vmem_to_hbm [thread:$0]  (%p3213_p5), %s4372_s10, 2048, %s4370_s15, %s4378_s25, %s3139_s29, %s3139_s29, %s3134_s18  }
 0x279 PF: > { %p3018_p1 = scmp.ge.s32.totalorder %s3126_s24, 2  ;;  %s2504_s12 = sand.u32 1, %s3114_s21  }
 0x27a   : > { %s2505_s11 = scalar_lea.sflag [#allocation3], %s2504_s12 }
 0x27b   : > { %p3015_p2 = pnand %p3018_p1, %p3217_p6 }
 0x27d   : > { %3109 = dma.done.wait (!%p3015_p2), %s2505_s11, 2048  }
 0x27e   : > { %3111 = vsyncadd (!%p3015_p2), %s2505_s11, 4294965248  ;;  %p16_p3 = scmp.ge.s32.totalorder %s3200_s27, 4   ;;  %s4429_s21 = smov %s3118_s22 }
 0x27f   : > { %s4430_s22 = smov %s3122_s23  ;;  %s4431_s23 = smov %s3211_s30 }
 0x280   : > { %s4432_s24 = smov %s3200_s27  ;;  %18 = sbr.rel (!%p16_p3) target bundleno = 3 (0x3), region = 95 }
 0x287   :  { %2510 = vsyncpa [#allocation3], 1 }
 0x288   :  { %2512 = vsyncpa [#allocation3 + $0x1], 1 }

</bundles_post_ra>
